<compile_context>
chip_gen: v7x
topology: tpu7x:2x2x1
jax: 0.10.0
libtpu: 0.0.40
codegen_flags: <defaults>
</compile_context>

<pallas_src>
import jax
import jax.numpy as jnp
from jax.experimental import pallas as pl
from jax.experimental.pallas import tpu as pltpu


def _round_up(n: int, m: int) -> int:
    return ((n + m - 1) // m) * m


def _vmem_cap_bytes() -> int:
    """Physical VMEM capacity (conservative fallback if query unavailable)."""
    try:
        return int(pltpu.get_tpu_info().vmem_capacity_bytes)
    except Exception:
        return 64 * 1024 * 1024  # v7x per-TensorCore VMEM (smallest of the three)


def highway_kernel(x_ref, w_ref, b_ref, o_ref):
    """One batch tile of the Highway forward.

    x_ref : (TB, D)    activations (f32 or bf16, streamed per grid step)
    w_ref : (D, 2D)    fused [W_gate^T | W_proj^T] (bf16 or f32, VMEM-resident)
    b_ref : (1, 2D)    fused [b_gate | b_proj] (f32, VMEM-resident)
    o_ref : (TB, D)    output tile (f32 or bf16)
    """
    x = x_ref[...]
    # Single MXU pass through the fused (D, 2D) weight, f32 accumulation.
    y = jnp.dot(x.astype(w_ref.dtype), w_ref[...],
                preferred_element_type=jnp.float32)
    y = y + b_ref[...]
    d = o_ref.shape[-1]                       # 128-aligned split -> no relayout
    gate = jnp.maximum(y[:, :d], 0.0)         # relu  -> VPU
    # sigmoid(z) = 0.5*tanh(0.5*z) + 0.5 : tanh runs on the EUP slot.
    proj = 0.5 * jnp.tanh(0.5 * y[:, d:]) + 0.5
    xf = x.astype(jnp.float32)
    # out = gate*proj + (1-gate)*x  ==  x + gate*(proj - x)
    o_ref[...] = (xf + gate * (proj - xf)).astype(o_ref.dtype)


def prepare_highway_params(w_gate, b_gate, w_proj, b_proj,
                           matmul_dtype=jnp.bfloat16):
    """Fuse PyTorch-layout (out, in) weights into one (D_pad, 2*D_pad) matrix.

    Done ONCE outside the hot path. D is zero-padded up to a multiple of 128 so
    the in-kernel gate/proj column split lands on a vreg lane-tile boundary.
    """
    d = w_gate.shape[0]
    d_pad = _round_up(max(d, 128), 128)

    def pad_w(w):  # (out, in) -> transposed (in, out), zero-padded to (d_pad, d_pad)
        return jnp.pad(w.T, ((0, d_pad - d), (0, d_pad - d)))

    def pad_b(b):
        return jnp.pad(b, (0, d_pad - d))

    w_fused = jnp.concatenate([pad_w(w_gate), pad_w(w_proj)], axis=1).astype(matmul_dtype)
    b_fused = jnp.concatenate([pad_b(b_gate), pad_b(b_proj)]).reshape(1, 2 * d_pad)
    return w_fused, b_fused.astype(jnp.float32)


def highway_forward(x, w_fused, b_fused, *, block_b=512, out_dtype=None,
                    x_buffers=2):
    """x: (B, D).  w_fused: (D_pad, 2*D_pad).  b_fused: (1, 2*D_pad)."""
    B, D = x.shape
    d_pad = w_fused.shape[0]
    assert w_fused.shape == (d_pad, 2 * d_pad), w_fused.shape
    assert b_fused.shape == (1, 2 * d_pad), b_fused.shape
    assert d_pad % 128 == 0 and D <= d_pad
    out_dtype = jnp.dtype(x.dtype if out_dtype is None else out_dtype)

    # Batch tile: multiple of 8 sublanes, up to block_b (default 512 — amortizes
    # the ~0.35us/step overhead and the per-dot RHS push into the MXU).
    tb = _round_up(min(block_b, _round_up(B, 8)), 8)
    pad_b = _round_up(B, tb)
    need_pad = (pad_b != B) or (d_pad != D)
    x_in = jnp.pad(x, ((0, pad_b - B), (0, d_pad - D))) if need_pad else x
    grid = (pad_b // tb,)

    # Advisory cost estimate for the XLA scheduler.
    bytes_accessed = (x_in.size * x_in.dtype.itemsize
                      + w_fused.size * w_fused.dtype.itemsize
                      + b_fused.size * b_fused.dtype.itemsize
                      + pad_b * d_pad * out_dtype.itemsize)
    cost = pl.CostEstimate(flops=2 * pad_b * d_pad * (2 * d_pad) + 6 * pad_b * d_pad,
                           transcendentals=pad_b * d_pad,
                           bytes_accessed=bytes_accessed)

    def _vmem_limit(w_bufs):
        need = (w_bufs * (w_fused.size * w_fused.dtype.itemsize   # resident weight
                          + b_fused.size * 4)                     # resident bias
                + x_buffers * tb * d_pad * x_in.dtype.itemsize    # x pipeline bufs
                + 2 * tb * d_pad * out_dtype.itemsize             # out double buffer
                + tb * d_pad * w_fused.dtype.itemsize             # in-kernel cast of x
                + tb * 2 * d_pad * 4                              # f32 y
                + 2 * tb * d_pad * 4)                             # gate/proj/mix temps
        cap = int(0.85 * _vmem_cap_bytes())                       # HW-aware cap (v7x: 64 MiB)
        return int(min(cap, max(8 * 1024 * 1024, 2 * need)))

    def _build(use_pipeline_mode):
        if use_pipeline_mode:
            # Constant-index weight/bias: single buffer (halves their VMEM).
            w_kw = {"pipeline_mode": pl.Buffered(1)}
            x_kw = {} if x_buffers == 2 else {"pipeline_mode": pl.Buffered(x_buffers)}
            w_bufs = 1
        else:
            w_kw, x_kw, w_bufs = {}, {}, 2
        return pl.pallas_call(
            highway_kernel,
            out_shape=jax.ShapeDtypeStruct((pad_b, d_pad), out_dtype),
            grid=grid,
            in_specs=[
                pl.BlockSpec((tb, d_pad), lambda i: (i, 0), **x_kw),        # streamed x
                pl.BlockSpec((d_pad, 2 * d_pad), lambda i: (0, 0), **w_kw),  # resident W
                pl.BlockSpec((1, 2 * d_pad), lambda i: (0, 0), **w_kw),      # resident b
            ],
            out_specs=pl.BlockSpec((tb, d_pad), lambda i: (i, 0)),
            compiler_params=pltpu.CompilerParams(
                dimension_semantics=("parallel",),
                vmem_limit_bytes=_vmem_limit(w_bufs)),
            cost_estimate=cost,
        )

    try:
        out = _build(True)(x_in, w_fused, b_fused)
    except Exception:
        # JAX build without BlockSpec(pipeline_mode=...) support: fall back to
        # default double-buffered pipelining (correct, slightly more VMEM).
        out = _build(False)(x_in, w_fused, b_fused)

    return out[:B, :D] if need_pad else out


def highway_ref(x, w_gate, b_gate, w_proj, b_proj):
    gate = jax.nn.relu(x @ w_gate.T + b_gate)
    proj = jax.nn.sigmoid(x @ w_proj.T + b_proj)
    return gate * proj + (1.0 - gate) * x


if __name__ == "__main__":
    key = jax.random.PRNGKey(0)

    def make_params(k, dim):
        kwg, kbg, kwp, kbp = jax.random.split(k, 4)
        bound = 1.0 / jnp.sqrt(jnp.float32(dim))
        w_gate = jax.random.uniform(kwg, (dim, dim), jnp.float32, -bound, bound)
        b_gate = jax.random.uniform(kbg, (dim,), jnp.float32, -bound, bound)
        w_proj = jax.random.uniform(kwp, (dim, dim), jnp.float32, -bound, bound)
        b_proj = jax.random.uniform(kbp, (dim,), jnp.float32, -bound, bound)
        return w_gate, b_gate, w_proj, b_proj

    # --- Case 1: lane-aligned D, multi-step batch grid, exact f32 path. ---
    B, D = 512, 128
    kx, kp, k_rest = jax.random.split(key, 3)
    x = jax.random.normal(kx, (B, D), dtype=jnp.float32)
    w_gate, b_gate, w_proj, b_proj = make_params(kp, D)
    ref = highway_ref(x, w_gate, b_gate, w_proj, b_proj)

    wf32, bf32 = prepare_highway_params(w_gate, b_gate, w_proj, b_proj,
                                        matmul_dtype=jnp.float32)
    out = highway_forward(x, wf32, bf32, block_b=128)   # 4-step batch grid
    jax.block_until_ready(out)
    assert out.shape == (B, D) and out.dtype == jnp.float32
    assert jnp.allclose(out, ref, atol=1e-5, rtol=1e-5), "f32 mismatch vs reference"

    # --- Case 2: performance path — bf16 weights + bf16 activations/output. ---
    wbf16, bbf16 = prepare_highway_params(w_gate, b_gate, w_proj, b_proj,
                                          matmul_dtype=jnp.bfloat16)
    x_bf16 = x.astype(jnp.bfloat16)            # producer-side dtype contract
    out_bf16 = highway_forward(x_bf16, wbf16, bbf16, out_dtype=jnp.bfloat16)
    jax.block_until_ready(out_bf16)
    assert out_bf16.shape == (B, D) and out_bf16.dtype == jnp.bfloat16
    assert jnp.allclose(out_bf16.astype(jnp.float32), ref, atol=6e-2, rtol=6e-2), \
        "bf16 mismatch vs reference"

    # --- Case 3: D not a multiple of 128 (padded once at weight-prep time). ---
    B2, D2 = 32, 64
    kx2, kp2 = jax.random.split(k_rest)
    x2 = jax.random.normal(kx2, (B2, D2), dtype=jnp.float32)
    params2 = make_params(kp2, D2)
    ref2 = highway_ref(x2, *params2)
    w2, b2 = prepare_highway_params(*params2, matmul_dtype=jnp.float32)
    out2 = highway_forward(x2, w2, b2)
    jax.block_until_ready(out2)
    assert out2.shape == (B2, D2) and out2.dtype == jnp.float32
    assert jnp.allclose(out2, ref2, atol=1e-5, rtol=1e-5), "padded-D mismatch vs reference"

    print("KERNEL_OK")
</pallas_src>

<mosaic_0001>
module attributes {stable_mosaic.version = 11 : i64} {
  func.func @highway_kernel(%arg0: i32, %arg1: memref<128x128xf32, #tpu.memory_space<vmem>>, %arg2: memref<128x256xf32, #tpu.memory_space<vmem>>, %arg3: memref<1x256xf32, #tpu.memory_space<vmem>>, %arg4: memref<128x128xf32, #tpu.memory_space<vmem>>) attributes {dimension_semantics = [#tpu.dimension_semantics<parallel>], iteration_bounds = array<i64: 4>, scalar_prefetch = 0 : i64, scratch_operands = 0 : i64, tpu.core_type = #tpu.core_type<tc>, window_params = [{transform_indices = @transform_0, window_bounds = array<i64: 128, 128>}, {pipeline_mode = #tpu.pipeline_mode<synchronous>, transform_indices = @transform_1, window_bounds = array<i64: 128, 256>}, {pipeline_mode = #tpu.pipeline_mode<synchronous>, transform_indices = @transform_2, window_bounds = array<i64: 1, 256>}, {transform_indices = @transform_3, window_bounds = array<i64: 128, 128>}]} {
    %c0 = arith.constant 0 : index
    %c0_0 = arith.constant 0 : index
    %0 = vector.load %arg1[%c0, %c0_0] : memref<128x128xf32, #tpu.memory_space<vmem>>, vector<128x128xf32>
    %c0_1 = arith.constant 0 : index
    %c0_2 = arith.constant 0 : index
    %1 = vector.load %arg2[%c0_1, %c0_2] : memref<128x256xf32, #tpu.memory_space<vmem>>, vector<128x256xf32>
    %cst = arith.constant dense<0.000000e+00> : vector<128x256xf32>
    %2 = tpu.matmul %0, %1, %cst {dimension_numbers = #tpu.dot_dimension_numbers<[1], [0], [0], [1], [0, 0, 1, 1], [], []>} : vector<128x128xf32>, vector<128x256xf32>, vector<128x256xf32> -> vector<128x256xf32>
    %c0_3 = arith.constant 0 : index
    %c0_4 = arith.constant 0 : index
    %3 = vector.load %arg3[%c0_3, %c0_4] : memref<1x256xf32, #tpu.memory_space<vmem>>, vector<1x256xf32>
    %4 = vector.broadcast %3 : vector<1x256xf32> to vector<128x256xf32>
    %5 = arith.addf %2, %4 : vector<128x256xf32>
    %6 = vector.extract_strided_slice %5 {offsets = [0, 0], sizes = [128, 128], strides = [1, 1]} : vector<128x256xf32> to vector<128x128xf32>
    %cst_5 = arith.constant 0.000000e+00 : f32
    %7 = vector.broadcast %cst_5 : f32 to vector<128x128xf32>
    %8 = arith.maximumf %6, %7 : vector<128x128xf32>
    %9 = vector.extract_strided_slice %5 {offsets = [0, 128], sizes = [128, 128], strides = [1, 1]} : vector<128x256xf32> to vector<128x128xf32>
    %cst_6 = arith.constant 5.000000e-01 : f32
    %10 = vector.broadcast %cst_6 : f32 to vector<128x128xf32>
    %11 = arith.mulf %10, %9 : vector<128x128xf32>
    %12 = math.tanh %11 : vector<128x128xf32>
    %cst_7 = arith.constant 5.000000e-01 : f32
    %13 = vector.broadcast %cst_7 : f32 to vector<128x128xf32>
    %14 = arith.mulf %13, %12 : vector<128x128xf32>
    %cst_8 = arith.constant 5.000000e-01 : f32
    %15 = vector.broadcast %cst_8 : f32 to vector<128x128xf32>
    %16 = arith.addf %14, %15 : vector<128x128xf32>
    %17 = arith.subf %16, %0 : vector<128x128xf32>
    %18 = arith.mulf %8, %17 : vector<128x128xf32>
    %19 = arith.addf %0, %18 : vector<128x128xf32>
    %c0_9 = arith.constant 0 : index
    %c0_10 = arith.constant 0 : index
    %20 = vector.load %arg4[%c0_9, %c0_10] : memref<128x128xf32, #tpu.memory_space<vmem>>, vector<128x128xf32>
    tpu.vector_store %arg4[%c0_9, %c0_10], %19 {strides = array<i32>} : memref<128x128xf32, #tpu.memory_space<vmem>>, vector<128x128xf32>,
    return
  }
  func.func @transform_0(%arg0: i32) -> (i32, i32) {
    %c0_i32 = arith.constant 0 : i32
    %c0_i32_0 = arith.constant 0 : i32
    return %arg0, %c0_i32 : i32, i32
  }
  func.func @transform_1(%arg0: i32) -> (i32, i32) {
    %c0_i32 = arith.constant 0 : i32
    %c0_i32_0 = arith.constant 0 : i32
    %c0_i32_1 = arith.constant 0 : i32
    return %c0_i32, %c0_i32_0 : i32, i32
  }
  func.func @transform_2(%arg0: i32) -> (i32, i32) {
    %c0_i32 = arith.constant 0 : i32
    %c0_i32_0 = arith.constant 0 : i32
    %c0_i32_1 = arith.constant 0 : i32
    return %c0_i32, %c0_i32_0 : i32, i32
  }
  func.func @transform_3(%arg0: i32) -> (i32, i32) {
    %c0_i32 = arith.constant 0 : i32
    %c0_i32_0 = arith.constant 0 : i32
    return %arg0, %c0_i32 : i32, i32
  }
}

module attributes {stable_mosaic.version = 11 : i64} {
  func.func @highway_kernel(%arg0: i32, %arg1: memref<128x128xf32, #tpu.memory_space<vmem>>, %arg2: memref<128x256xf32, #tpu.memory_space<vmem>>, %arg3: memref<1x256xf32, #tpu.memory_space<vmem>>, %arg4: memref<128x128xf32, #tpu.memory_space<vmem>>) attributes {dimension_semantics = [#tpu.dimension_semantics<parallel>], iteration_bounds = array<i64: 4>, scalar_prefetch = 0 : i64, scratch_operands = 0 : i64, tpu.core_type = #tpu.core_type<tc>, window_params = [{transform_indices = @transform_0, window_bounds = array<i64: 128, 128>}, {pipeline_mode = #tpu.pipeline_mode<synchronous>, transform_indices = @transform_1, window_bounds = array<i64: 128, 256>}, {pipeline_mode = #tpu.pipeline_mode<synchronous>, transform_indices = @transform_2, window_bounds = array<i64: 1, 256>}, {transform_indices = @transform_3, window_bounds = array<i64: 128, 128>}]} {
    %c0 = arith.constant 0 : index
    %c0_0 = arith.constant 0 : index
    %0 = vector.load %arg1[%c0, %c0_0] : memref<128x128xf32, #tpu.memory_space<vmem>>, vector<128x128xf32>
    %c0_1 = arith.constant 0 : index
    %c0_2 = arith.constant 0 : index
    %1 = vector.load %arg2[%c0_1, %c0_2] : memref<128x256xf32, #tpu.memory_space<vmem>>, vector<128x256xf32>
    %cst = arith.constant dense<0.000000e+00> : vector<128x256xf32>
    %2 = tpu.matmul %0, %1, %cst {dimension_numbers = #tpu.dot_dimension_numbers<[1], [0], [0], [1], [0, 0, 1, 1], [], []>} : vector<128x128xf32>, vector<128x256xf32>, vector<128x256xf32> -> vector<128x256xf32>
    %c0_3 = arith.constant 0 : index
    %c0_4 = arith.constant 0 : index
    %3 = vector.load %arg3[%c0_3, %c0_4] : memref<1x256xf32, #tpu.memory_space<vmem>>, vector<1x256xf32>
    %4 = vector.broadcast %3 : vector<1x256xf32> to vector<128x256xf32>
    %5 = arith.addf %2, %4 : vector<128x256xf32>
    %6 = vector.extract_strided_slice %5 {offsets = [0, 0], sizes = [128, 128], strides = [1, 1]} : vector<128x256xf32> to vector<128x128xf32>
    %cst_5 = arith.constant 0.000000e+00 : f32
    %7 = vector.broadcast %cst_5 : f32 to vector<128x128xf32>
    %8 = arith.maximumf %6, %7 : vector<128x128xf32>
    %9 = vector.extract_strided_slice %5 {offsets = [0, 128], sizes = [128, 128], strides = [1, 1]} : vector<128x256xf32> to vector<128x128xf32>
    %cst_6 = arith.constant 5.000000e-01 : f32
    %10 = vector.broadcast %cst_6 : f32 to vector<128x128xf32>
    %11 = arith.mulf %10, %9 : vector<128x128xf32>
    %12 = math.tanh %11 : vector<128x128xf32>
    %cst_7 = arith.constant 5.000000e-01 : f32
    %13 = vector.broadcast %cst_7 : f32 to vector<128x128xf32>
    %14 = arith.mulf %13, %12 : vector<128x128xf32>
    %cst_8 = arith.constant 5.000000e-01 : f32
    %15 = vector.broadcast %cst_8 : f32 to vector<128x128xf32>
    %16 = arith.addf %14, %15 : vector<128x128xf32>
    %17 = arith.subf %16, %0 : vector<128x128xf32>
    %18 = arith.mulf %8, %17 : vector<128x128xf32>
    %19 = arith.addf %0, %18 : vector<128x128xf32>
    %c0_9 = arith.constant 0 : index
    %c0_10 = arith.constant 0 : index
    %20 = vector.load %arg4[%c0_9, %c0_10] : memref<128x128xf32, #tpu.memory_space<vmem>>, vector<128x128xf32>
    tpu.vector_store %arg4[%c0_9, %c0_10], %19 {strides = array<i32>} : memref<128x128xf32, #tpu.memory_space<vmem>>, vector<128x128xf32>,
    return
  }
  func.func @transform_0(%arg0: i32) -> (i32, i32) {
    %c0_i32 = arith.constant 0 : i32
    %c0_i32_0 = arith.constant 0 : i32
    return %arg0, %c0_i32 : i32, i32
  }
  func.func @transform_1(%arg0: i32) -> (i32, i32) {
    %c0_i32 = arith.constant 0 : i32
    %c0_i32_0 = arith.constant 0 : i32
    %c0_i32_1 = arith.constant 0 : i32
    return %c0_i32, %c0_i32_0 : i32, i32
  }
  func.func @transform_2(%arg0: i32) -> (i32, i32) {
    %c0_i32 = arith.constant 0 : i32
    %c0_i32_0 = arith.constant 0 : i32
    %c0_i32_1 = arith.constant 0 : i32
    return %c0_i32, %c0_i32_0 : i32, i32
  }
  func.func @transform_3(%arg0: i32) -> (i32, i32) {
    %c0_i32 = arith.constant 0 : i32
    %c0_i32_0 = arith.constant 0 : i32
    return %arg0, %c0_i32 : i32, i32
  }
}

</mosaic_0001>

<bundles_post_ra>
// kernel: tpu_custom_call.1
= control target key start
LH: loop header
LB: loop body
LE: loop exit
PB: predicated region body
PF: predicated region fallthrough
CT: control target
= control target key end

     0   :  { %8 = vsyncpa [#allocation3], 0  ;;  %s1394_s0 = inlined_call_operand.hbm [shape: f32[512,128], index: 0, kind: input, shape index: {}]   ;;  %s1395_s1 = inlined_call_operand.hbm [shape: f32[128,256], index: 1, kind: input, shape index: {}]   ;;  %s1396_s2 = inlined_call_operand.vmem [shape: f32[1,256], index: 2, kind: input, shape index: {}]   ;;  %s1397_s3 = inlined_call_operand.hbm [shape: f32[512,128], index: 3, kind: output, shape index: {}]  }
   0x1   :  { %10 = vsyncpa [#allocation3 + $0x1], 0 }
   0x2   :  { %11 = vsyncpa [#allocation6], 0 }
   0x3   :  { %12 = vsyncpa [#allocation4], 0 }
   0x4   :  { %14 = vsyncpa [#allocation4 + $0x1], 0  ;;  %s990_s12 = smov 0   ;;  %s992_s13 = smov 0  }
   0x5   :  { %s994_s14 = smov 0   ;;  %s996_s15 = smov 0  }
   0x6 LB: > { %s1011_s16 = sadd.s32 4294967295, %s958_s15   ;;  %s668_s17 = sadd.s32 4294967294, %s958_s15   ;;  %s958_s15 = sphi %s996_s15, %s1416_s15   ;;  %s954_s14 = sphi %s994_s14, %s1415_s14   ;;  %s950_s13 = sphi %s992_s13, %s1414_s13   ;;  %s946_s12 = sphi %s990_s12, %s1413_s12  }
   0x7   : > { %p40_p0 = scmp.ne.s32.totalorder %s950_s13, %s946_s12  ;;  %p1398_p1 = scmp.eq.s32.totalorder %s1011_s16, 0 }
   0x8   : > { %p112_p3 = scmp.eq.s32.totalorder %s668_s17, 3  ;;  %p669_p5 = scmp.ge.s32.totalorder %s958_s15, 1 }
   0x9   : > { %p1020_p4 = por %p1398_p1, %p40_p0  ;;  %p119_p7 = scmp.lt.s32.totalorder %s958_s15, 5 }
   0xa   : > { %p1025_p6 = por %p112_p3, %p40_p0  ;;  %s960_s21 = smov [#allocation5]  }
   0xb   : > { %s1401_s18 = scalar_select %p1020_p4, 1, 0 }
   0xc   : > { %s1402_s19 = scalar_select %p1025_p6, 1, 0 }
   0xd   : > { %p1030_p8 = pnand %p669_p5, %p119_p7  ;;  %s131_s22 = sshll.u32 %s960_s21, 4  ;;  %s132_s22 = int_to_ptr.vmem [resolvable:$true] %s131_s22 }
   0xe   : > { %s1043_s24 = sadd.s32 1, %s958_s15   ;;  %s27_s25 = sadd.s32 1, %s954_s14 }
   0xf   : > { %s1403_s20 = scalar_select %p1030_p8, 1, 0 }
  0x10   : > { %p742_p9 = pneg %p1030_p8  ;;  %s24_s26 = ssub.s32 %s958_s15, %s1043_s24 }
  0x11   : > { %s830_s29 = scalar_lea.hbm %s1395_s1, 4096 }
  0x12   : > { %p1038_p10 = pnand %p742_p9, %p1398_p1  ;;  %p831_p11 = scmp.ne.s32.totalorder %s1395_s1, %s830_s29 }
  0x13   : > { %p837_p3 = scmp.lt.u32.totalorder %s830_s29, %s1395_s1 }
  0x14   : > { %p832_p12 = pneg %p1038_p10 }
  0x16   : > { %p833_p13 = pnand %p832_p12, %p831_p11 }
  0x18   : > { %p834_p0 = pneg %p833_p13 }
  0x1a   : > { %p839_p5 = pnand %p837_p3, %p834_p0 }
  0x1c   : > { %842 = shalt.err (!%p839_p5)
}
  0x1d   : > { %s843_s7 = scalar_lea.vmem %s132_s22, 4096  ;;  %p851_p2 = scmp.lt.s32.totalorder %s132_s22, %s132_s22 }
  0x1e   : > { %p844_p7 = scmp.ne.s32.totalorder %s132_s22, %s843_s7  ;;  %p852_p6 = scmp.lt.s32.totalorder %s843_s7, %s843_s7 }
  0x20   : > { %p846_p9 = pnand %p844_p7, %p832_p12  ;;  %p853_p4 = por %p852_p6, %p851_p2 }
  0x22   : > { %p847_p1 = pneg %p846_p9 }
  0x24   : > { %p854_p8 = pnand %p853_p4, %p847_p1 }
  0x26   : > { %857 = shalt.err (!%p854_p8)
}
  0x27   : > { %s961_s8 = smov 256   ;;  %s962_s9 = smov 16  }
  0x28   : > { %745 = dma.hbm_to_vmem [thread:$0]  (!%p1038_p10), %s1395_s1, 4096, %s132_s22, [#allocation6], %s961_s8, %s961_s8, %s962_s9  }
  0x29   : > { %p25_p11 = scmp.eq.s32.totalorder %s24_s26, 0  ;;  %p34_p2 = scmp.ne.s32.totalorder %s954_s14, %s950_s13 }
  0x2a   : > { %p35_p1 = scmp.eq.s32.totalorder %s958_s15, 0  ;;  %p755_p4 = scmp.lt.s32.totalorder %s958_s15, 4 }
  0x2b   : > { %s1069_s17 = scalar_select %p25_p11, %s954_s14, %s27_s25  }
  0x2c   : > { %p36_p6 = por %p35_p1, %p34_p2  ;;  %p1405_p8 = scmp.eq.s32.totalorder %s1011_s16, 3 }
  0x2d   : > { %s148_s27 = sand.u32 1, %s954_s14   ;;  %s684_s28 = sshll.u32 %s958_s15, 11 }
  0x2e   : > { %p1073_p12 = por %p1405_p8, %p34_p2  ;;  %s672_s29 = sshll.u32 %s148_s27, 7 }
  0x2f   : > { %s1082_s4 = scalar_lea.hbm %s1394_s0, %s684_s28  ;;  %s152_s22 = scalar_lea.vmem [#allocation2], %s672_s29 }
  0x30   : > { %s159_s25 = sshll.u32 %s152_s22, 4  ;;  %p1084_p10 = pnand %p755_p4, %p36_p6  ;;  %s1088_s25 = int_to_ptr.vmem [resolvable:$true] %s159_s25 }
  0x31   : > { %s1090_s5 = scalar_lea.sflag [#allocation3], %s148_s27  ;;  %s858_s6 = scalar_lea.hbm %s1082_s4, 2048 }
  0x32   : > { %p859_p13 = scmp.ne.s32.totalorder %s1082_s4, %s858_s6  ;;  %p860_p0 = pneg %p1084_p10 }
  0x33   : > { %s863_s9 = scalar_lea.hbm %s1394_s0, 8192  ;;  %p864_p7 = scmp.lt.u32.totalorder %s1082_s4, %s1394_s0 }
  0x34   : > { %p861_p3 = pnand %p860_p0, %p859_p13  ;;  %p865_p9 = scmp.lt.u32.totalorder %s863_s9, %s858_s6 }
  0x35   : > { %p867_p2 = scmp.lt.u32.totalorder %s858_s6, %s1082_s4 }
  0x36   : > { %p862_p5 = pneg %p861_p3  ;;  %p866_p11 = por %p865_p9, %p864_p7 }
  0x38   : > { %p868_p1 = por %p867_p2, %p866_p11 }
  0x3a   : > { %p869_p4 = pnand %p868_p1, %p862_p5 }
  0x3c   : > { %872 = shalt.err (!%p869_p4)
}
  0x3d   : > { %s873_s27 = scalar_lea.vmem %s1088_s25, 2048  ;;  %s963_s28 = smov [#allocation2]  }
  0x3e   : > { %p874_p6 = scmp.ne.s32.totalorder %s1088_s25, %s873_s27  ;;  %s878_s29 = sshll.u32 %s963_s28, 4  ;;  %s879_s29 = int_to_ptr.vmem [resolvable:$false] %s878_s29 }
  0x3f   : > { %s880_s23 = scalar_lea.vmem %s879_s29, 4096  ;;  %p881_p3 = scmp.lt.s32.totalorder %s1088_s25, %s879_s29 }
  0x40   : > { %p876_p8 = pnand %p874_p6, %p860_p0  ;;  %p882_p7 = scmp.lt.s32.totalorder %s880_s23, %s873_s27 }
  0x42   : > { %p877_p13 = pneg %p876_p8  ;;  %p883_p9 = por %p882_p7, %p881_p3 }
  0x44   : > { %p884_p11 = pnand %p883_p9, %p877_p13 }
  0x46   : > { %887 = shalt.err (!%p884_p11)
}
  0x47   : > { %s964_s30 = smov 128   ;;  %s965_s22 = smov 8  }
  0x48   : > { %749 = dma.hbm_to_vmem [thread:$0]  (!%p1084_p10), %s1082_s4, 2048, %s1088_s25, %s1090_s5, %s964_s30, %s964_s30, %s965_s22  }
  0x49   : > { %p1408_p0 = scmp.ne.s32.totalorder %s1403_s20, 0 }
  0x4a   : > { %s1121_s6 = sand.u32 (!%p1408_p0), 1, %s950_s13   ;;  %p1409_p5 = scmp.ne.s32.totalorder (!%p1408_p0), %s1401_s18, 0 }
  0x4b   : > { %171 = sbr.rel (%p1408_p0) target bundleno = 409 (0x199), region = 32  ;;  %s676_s7 = sshll.u32 (!%p1408_p0), %s1121_s6, 7 }
  0x4c   : > { %s174_s8 = scalar_lea.sflag (!%p1408_p0), [#allocation3], %s1121_s6  ;;  %s1127_s9 = scalar_lea.vmem (!%p1408_p0), [#allocation2], %s676_s7 }
  0x52   : > { %933 = dma.done.wait (%p1409_p5), %s174_s8, 2048  }
  0x53   : > { %935 = vsyncadd (%p1409_p5), %s174_s8, 4294965248  ;;  %p1410_p10 = scmp.eq.s32.totalorder %s1011_s16, 0 }
  0x55   : > { %937 = dma.done.wait (%p1410_p10), [#allocation6], 4096   ;;  %p1411_p2 = pmov %p1410_p10 }
  0x56   : > { %v966_v0 = vmov 0.0   ;;  %v223_v1 = vld [vmem:[#allocation5 + $0x8] sm:$0xff]  ;;  %v225_v2 = vld [vmem:[#allocation5 + $0x18] sm:$0xff]  ;;  %v222_v3 = vld [vmem:[#allocation5] sm:$0xff]  ;;  %s1274_s4 = scalar_lea.vmem [#allocation7], %s676_s7  ;;  %s685_s25 = sshll.u32 %s1011_s16, 11 }
  0x57   : > { %939 = vsyncadd (%p1411_p2), [#allocation6], 4294963200  ;;  %330 = vmatprep.mubr.f32.mxu0 %v966_v0  ;;  %378 = vmatprep.mubr.f32.mxu1 %v966_v0  ;;  %v686_v4 = vpack.c.bf16 %v225_v2, %v223_v1  ;;  %v224_v5 = vld [vmem:[#allocation5 + $0x10] sm:$0xff]  ;;  %v227_v6 = vld [vmem:[#allocation5 + $0x28] sm:$0xff]  ;;  %v256_v2 = vlaneseq  ;;  %s585_s26 = sshll.u32 %s1274_s4, 4  ;;  %s1346_s11 = scalar_lea.hbm %s1397_s3, %s685_s25  ;;  %s1348_s26 = int_to_ptr.vmem [resolvable:$true] %s585_s26 }
  0x58   : > { %v229_v7 = vld [vmem:[#allocation5 + $0x38] sm:$0xff]  ;;  %v688_v8 = vpack.c.bf16 %v224_v5, %v222_v3  ;;  %v226_v10 = vld [vmem:[#allocation5 + $0x20] sm:$0xff]  ;;  %v228_v11 = vld [vmem:[#allocation5 + $0x30] sm:$0xff]  ;;  %s572_s27 = scalar_lea.sflag [#allocation4], %s1121_s6  ;;  %s888_s16 = scalar_lea.vmem %s1348_s26, 2048 }
  0x59   : > { %v690_v9 = vpack.c.bf16 %v229_v7, %v227_v6  ;;  %v231_v12 = vld [vmem:[#allocation5 + $0x48] sm:$0xff]  ;;  %687 = vmatprep.subr.bf16.mxu0 %v686_v4  ;;  %718 = vmatprep.subr.bf16.mxu1 %v686_v4  ;;  %v233_v13 = vld [vmem:[#allocation5 + $0x58] sm:$0xff]  ;;  %v692_v14 = vpack.c.bf16 %v228_v11, %v226_v10  ;;  %v230_v16 = vld [vmem:[#allocation5 + $0x40] sm:$0xff]  ;;  %v257_v3 = vshrl.u32 %v256_v2, 7  ;;  %p889_p1 = scmp.ne.s32.totalorder %s1348_s26, %s888_s16  ;;  %s967_s28 = smov [#allocation7]  }
  0x5a   : > { %689 = vmatpush1.bf16.msra.mxu0 %v688_v8  ;;  %726 = vmatpush1.bf16.msra.mxu1 %v688_v8  ;;  %v694_v15 = vpack.c.bf16 %v233_v13, %v231_v12  ;;  %v232_v17 = vld [vmem:[#allocation5 + $0x50] sm:$0xff]  ;;  %v235_v18 = vld [vmem:[#allocation5 + $0x68] sm:$0xff]  ;;  %v237_v19 = vld [vmem:[#allocation5 + $0x78] sm:$0xff]  ;;  %s892_s29 = sshll.u32 %s967_s28, 4  ;;  %s893_s29 = int_to_ptr.vmem [resolvable:$false] %s892_s29 }
  0x5b   : > { %691 = vmatprep.subr.bf16.mxu0 %v690_v9  ;;  %719 = vmatprep.subr.bf16.mxu1 %v690_v9  ;;  %v696_v20 = vpack.c.bf16 %v232_v17, %v230_v16  ;;  %v698_v21 = vpack.c.bf16 %v237_v19, %v235_v18  ;;  %v234_v22 = vld [vmem:[#allocation5 + $0x60] sm:$0xff]  ;;  %v236_v23 = vld [vmem:[#allocation5 + $0x70] sm:$0xff]  ;;  %v239_v24 = vld [vmem:[#allocation5 + $0x88] sm:$0xff]  ;;  %v262_v4 = vsub.s32 1, %v257_v3  ;;  %v258_v16 = vsub.s32 0, %v257_v3  ;;  %p890_p4 = pnand %p889_p1, %p1073_p12  ;;  %s894_s23 = scalar_lea.vmem %s893_s29, 4096 }
  0x5c   : > { %v241_v25 = vld [vmem:[#allocation5 + $0x98] sm:$0xff]  ;;  %v700_v26 = vpack.c.bf16 %v236_v23, %v234_v22  ;;  %v238_v28 = vld [vmem:[#allocation5 + $0x80] sm:$0xff]  ;;  %v240_v29 = vld [vmem:[#allocation5 + $0x90] sm:$0xff]  ;;  %p895_p8 = scmp.lt.s32.totalorder %s1348_s26, %s893_s29  ;;  %p896_p13 = scmp.lt.s32.totalorder %s894_s23, %s888_s16 }
  0x5d   : > { %v702_v27 = vpack.c.bf16 %v241_v25, %v239_v24  ;;  %v243_v30 = vld [vmem:[#allocation5 + $0xa8] sm:$0xff]  ;;  %v245_v31 = vld [vmem:[#allocation5 + $0xb8] sm:$0xff]  ;;  %v704_v32 = vpack.c.bf16 %v240_v29, %v238_v28  ;;  %v242_v34 = vld [vmem:[#allocation5 + $0xa0] sm:$0xff]  ;;  %p891_p6 = pneg %p890_p4 }
  0x5e   : > { %693 = vmatpush1.bf16.msra.mxu0 %v692_v14  ;;  %727 = vmatpush1.bf16.msra.mxu1 %v692_v14  ;;  %v706_v33 = vpack.c.bf16 %v245_v31, %v243_v30  ;;  %v244_v35 = vld [vmem:[#allocation5 + $0xb0] sm:$0xff]  ;;  %v247_v36 = vld [vmem:[#allocation5 + $0xc8] sm:$0xff]  ;;  %v249_v37 = vld [vmem:[#allocation5 + $0xd8] sm:$0xff]  ;;  %p897_p3 = por %p896_p13, %p895_p8 }
  0x5f   : > { %695 = vmatprep.subr.bf16.mxu0 %v694_v15  ;;  %720 = vmatprep.subr.bf16.mxu1 %v694_v15  ;;  %v708_v38 = vpack.c.bf16 %v244_v35, %v242_v34  ;;  %v710_v39 = vpack.c.bf16 %v249_v37, %v247_v36  ;;  %v246_v40 = vld [vmem:[#allocation5 + $0xc0] sm:$0xff]  ;;  %v248_v41 = vld [vmem:[#allocation5 + $0xd0] sm:$0xff]  ;;  %v251_v42 = vld [vmem:[#allocation5 + $0xe8] sm:$0xff] }
  0x60   : > { %v253_v43 = vld [vmem:[#allocation5 + $0xf8] sm:$0xff]  ;;  %v712_v44 = vpack.c.bf16 %v248_v41, %v246_v40  ;;  %v250_v46 = vld [vmem:[#allocation5 + $0xe0] sm:$0xff]  ;;  %v252_v47 = vld [vmem:[#allocation5 + $0xf0] sm:$0xff]  ;;  %p898_p7 = pnand %p897_p3, %p891_p6 }
  0x61   : > { %v714_v45 = vpack.c.bf16 %v253_v43, %v251_v42  ;;  %v716_v48 = vpack.c.bf16 %v252_v47, %v250_v46  ;;  %v1140_v49 = vld [vmem:[%s1127_s9] sm:$0xff]  ;;  %v1150_v51 = vld [vmem:[%s1127_s9 + $0x8] sm:$0xff]  ;;  %v1160_v53 = vld [vmem:[%s1127_s9 + $0x10] sm:$0xff] }
  0x62   : > { %697 = vmatpush1.bf16.msra.mxu0 %v696_v20  ;;  %728 = vmatpush1.bf16.msra.mxu1 %v696_v20  ;;  %v1143_v50 = vld [vmem:[%s1127_s9 + $0x40] sm:$0xff]  ;;  %v1153_v52 = vld [vmem:[%s1127_s9 + $0x48] sm:$0xff]  ;;  %v1163_v54 = vld [vmem:[%s1127_s9 + $0x50] sm:$0xff] }
  0x63   : > { %699 = vmatprep.subr.bf16.mxu0 %v698_v21  ;;  %721 = vmatprep.subr.bf16.mxu1 %v698_v21  ;;  %v1170_v55 = vld [vmem:[%s1127_s9 + $0x18] sm:$0xff]  ;;  %v1180_v57 = vld [vmem:[%s1127_s9 + $0x20] sm:$0xff]  ;;  %v1190_v59 = vld [vmem:[%s1127_s9 + $0x28] sm:$0xff] }
  0x64   : > { %v1173_v56 = vld [vmem:[%s1127_s9 + $0x58] sm:$0xff]  ;;  %v1183_v58 = vld [vmem:[%s1127_s9 + $0x60] sm:$0xff]  ;;  %v1193_v60 = vld [vmem:[%s1127_s9 + $0x68] sm:$0xff] }
  0x65   : > { %v1200_v61 = vld [vmem:[%s1127_s9 + $0x30] sm:$0xff]  ;;  %v1210_v63 = vld [vmem:[%s1127_s9 + $0x38] sm:$0xff]  ;;  %v254_v5 = vld [vmem:[%s1396_s2] sm:$0x3] }
  0x66   : > { %701 = vmatpush1.bf16.msra.mxu0 %v700_v26  ;;  %729 = vmatpush1.bf16.msra.mxu1 %v700_v26  ;;  %v1203_v62 = vld [vmem:[%s1127_s9 + $0x70] sm:$0xff]  ;;  %v1213_v1 = vld [vmem:[%s1127_s9 + $0x78] sm:$0xff]  ;;  %v1220_v6 = vrot.slane %v254_v5, %v262_v4  ;;  %v1226_v25 = vrot.slane %v254_v5, %v258_v16 }
  0x67   : > { %703 = vmatprep.subr.bf16.mxu0 %v702_v27  ;;  %722 = vmatprep.subr.bf16.mxu1 %v702_v27 }
  0x6a   : > { %705 = vmatpush1.bf16.msra.mxu0 %v704_v32  ;;  %730 = vmatpush1.bf16.msra.mxu1 %v704_v32 }
  0x6b   : > { %707 = vmatprep.subr.bf16.mxu0 %v706_v33  ;;  %723 = vmatprep.subr.bf16.mxu1 %v706_v33 }
  0x6e   : > { %709 = vmatpush1.bf16.msra.mxu0 %v708_v38  ;;  %731 = vmatpush1.bf16.msra.mxu1 %v708_v38 }
  0x6f   : > { %711 = vmatprep.subr.bf16.mxu0 %v710_v39  ;;  %724 = vmatprep.subr.bf16.mxu1 %v710_v39 }
  0x72   : > { %713 = vmatpush1.bf16.msra.mxu0 %v712_v44  ;;  %732 = vmatpush1.bf16.msra.mxu1 %v712_v44 }
  0x73   : > { %715 = vmatprep.subr.bf16.mxu0 %v714_v45  ;;  %725 = vmatprep.subr.bf16.mxu1 %v714_v45 }
  0x76   : > { %717 = vmatpush1.bf16.msra.mxu0 %v716_v48  ;;  %733 = vmatpush1.bf16.msra.mxu1 %v716_v48 }
  0x79   : > { %331 = vmatmul.mubr.f32.vlgmr.msra.gmra.mrb[0].mxu0 %v1140_v49  ;;  %379 = vmatmul.mubr.f32.vlgmr.msra.gmra.mrb[0].mxu1 %v1143_v50 }
  0x7a   : > { %336 = vmatprep.mubr.f32.mxu0 %v966_v0  ;;  %384 = vmatprep.mubr.f32.mxu1 %v966_v0 }
  0x7d   : > { %337 = vmatmul.mubr.f32.gmra.mrb[2].mxu0 %v1150_v51  ;;  %385 = vmatmul.mubr.f32.gmra.mrb[2].mxu1 %v1153_v52 }
  0x7e   : > { %342 = vmatprep.mubr.f32.mxu0 %v966_v0  ;;  %390 = vmatprep.mubr.f32.mxu1 %v966_v0 }
  0x81   : > { %343 = vmatmul.mubr.f32.gmra.mrb[4].mxu0 %v1160_v53  ;;  %391 = vmatmul.mubr.f32.gmra.mrb[4].mxu1 %v1163_v54 }
  0x82   : > { %348 = vmatprep.mubr.f32.mxu0 %v966_v0  ;;  %396 = vmatprep.mubr.f32.mxu1 %v966_v0 }
  0x85   : > { %349 = vmatmul.mubr.f32.gmra.mrb[6].mxu0 %v1170_v55  ;;  %397 = vmatmul.mubr.f32.gmra.mrb[6].mxu1 %v1173_v56 }
  0x86   : > { %354 = vmatprep.mubr.f32.mxu0 %v966_v0  ;;  %402 = vmatprep.mubr.f32.mxu1 %v966_v0 }
  0x89   : > { %355 = vmatmul.mubr.f32.gmra.mrb[8].mxu0 %v1180_v57  ;;  %403 = vmatmul.mubr.f32.gmra.mrb[8].mxu1 %v1183_v58 }
  0x8a   : > { %360 = vmatprep.mubr.f32.mxu0 %v966_v0  ;;  %408 = vmatprep.mubr.f32.mxu1 %v966_v0 }
  0x8d   : > { %361 = vmatmul.mubr.f32.gmra.mrb[10].mxu0 %v1190_v59  ;;  %409 = vmatmul.mubr.f32.gmra.mrb[10].mxu1 %v1193_v60 }
  0x8e   : > { %366 = vmatprep.mubr.f32.mxu0 %v966_v0  ;;  %414 = vmatprep.mubr.f32.mxu1 %v966_v0 }
  0x91   : > { %367 = vmatmul.mubr.f32.gmra.mrb[12].mxu0 %v1200_v61  ;;  %415 = vmatmul.mubr.f32.gmra.mrb[12].mxu1 %v1203_v62 }
  0x92   : > { %372 = vmatprep.mubr.f32.mxu0 %v966_v0  ;;  %420 = vmatprep.mubr.f32.mxu1 %v966_v0 }
  0x95   : > { %373 = vmatmul.mubr.f32.gmra.mrb[14].mxu0 %v1210_v63  ;;  %421 = vmatmul.mubr.f32.gmra.mrb[14].mxu1 %v1213_v1 }
 0x14c   : > { %v332_v7 = vpop.f32.mrb[0].mxu0  ;;  %v380_v8 = vpop.f32.mrb[0].mxu1 }
 0x14d   : > { %v334_v0 = vpop.f32.mrb[1].mxu0  ;;  %v382_v9 = vpop.f32.mrb[1].mxu1  ;;  %v333_v34 = vadd.f32 %v332_v7, %v1226_v25  ;;  %v381_v39 = vadd.f32 %v380_v8, %v1226_v25 }
 0x14e   : > { %v335_v10 = vadd.f32 %v334_v0, %v1220_v6  ;;  %v383_v11 = vadd.f32 %v382_v9, %v1220_v6 }
 0x14f   : > { %v427_v47 = vmax.f32 %v333_v34, 0.0  ;;  %v435_v9 = vmax.f32 %v381_v39, 0.0 }
 0x150   : > { %v443_v12 = vmul.f32 0.5, %v335_v10  ;;  %v451_v13 = vmul.f32 0.5, %v383_v11  ;;  %v338_v14 = vpop.f32.mrb[2].mxu0  ;;  %v386_v15 = vpop.f32.mrb[2].mxu1 }
 0x151   : > { %v340_v17 = vpop.f32.mrb[3].mxu0  ;;  %v388_v18 = vpop.f32.mrb[3].mxu1  ;;  %v1237_v41 = vadd.f32 %v338_v14, %v1226_v25  ;;  %v387_v2 = vadd.f32 %v386_v15, %v1226_v25 }
 0x152   : > { %798 = vtanh.f32 %v443_v12  ;;  %v341_v19 = vadd.f32 %v340_v17, %v1220_v6  ;;  %v389_v20 = vadd.f32 %v388_v18, %v1220_v6 }
 0x153   : > { %800 = vtanh.f32 %v451_v13  ;;  %v428_v14 = vmax.f32 %v1237_v41, 0.0 }
 0x154   : > { %v444_v21 = vmul.f32 0.5, %v341_v19  ;;  %v452_v22 = vmul.f32 0.5, %v389_v20  ;;  %v344_v23 = vpop.f32.mrb[4].mxu0  ;;  %v392_v24 = vpop.f32.mrb[4].mxu1 }
 0x155   : > { %v346_v26 = vpop.f32.mrb[5].mxu0  ;;  %v394_v27 = vpop.f32.mrb[5].mxu1  ;;  %v1245_v3 = vadd.f32 %v344_v23, %v1226_v25  ;;  %v1250_v11 = vadd.f32 %v392_v24, %v1226_v25 }
 0x156   : > { %802 = vtanh.f32 %v444_v21  ;;  %v347_v28 = vadd.f32 %v346_v26, %v1220_v6  ;;  %v395_v29 = vadd.f32 %v394_v27, %v1220_v6  ;;  %v436_v21 = vmax.f32 %v387_v2, 0.0 }
 0x157   : > { %804 = vtanh.f32 %v452_v22  ;;  %v429_v23 = vmax.f32 %v1245_v3, 0.0  ;;  %v437_v34 = vmax.f32 %v1250_v11, 0.0 }
 0x158   : > { %v445_v30 = vmul.f32 0.5, %v347_v28  ;;  %v453_v31 = vmul.f32 0.5, %v395_v29  ;;  %v350_v32 = vpop.f32.mrb[6].mxu0  ;;  %v1230_v33 = vpop.f32.mrb[6].mxu1 }
 0x159   : > { %v352_v35 = vpop.f32.mrb[7].mxu0  ;;  %v400_v36 = vpop.f32.mrb[7].mxu1 }
 0x15a   : > { %806 = vtanh.f32 %v445_v30  ;;  %v353_v37 = vadd.f32 %v352_v35, %v1220_v6  ;;  %v401_v38 = vadd.f32 %v400_v36, %v1220_v6 }
 0x15b   : > { %808 = vtanh.f32 %v453_v31 }
 0x15c   : > { %v799_v40 = vpop.eup %798  ;;  %v446_v42 = vmul.f32 0.5, %v353_v37  ;;  %v454_v43 = vmul.f32 0.5, %v401_v38  ;;  %v1239_v44 = vpop.f32.mrb[8].mxu0  ;;  %v351_v38 = vadd.f32 %v350_v32, %v1226_v25 }
 0x15d   : > { %v1241_v45 = vpop.f32.mrb[8].mxu1  ;;  %v801_v46 = vpop.eup %800  ;;  %v475_v48 = vmul.f32 0.5, %v799_v40 }
 0x15e   : > { %v358_v4 = vpop.f32.mrb[9].mxu0  ;;  %v406_v5 = vpop.f32.mrb[9].mxu1  ;;  %v483_v7 = vmul.f32 0.5, %v801_v46  ;;  %810 = vtanh.f32 %v446_v42  ;;  %v430_v11 = vmax.f32 %v351_v38, 0.0 }
 0x15f   : > { %v359_v8 = vadd.f32 %v358_v4, %v1220_v6  ;;  %v407_v0 = vadd.f32 %v406_v5, %v1220_v6  ;;  %v491_v10 = vadd.f32 0.5, %v475_v48  ;;  %812 = vtanh.f32 %v454_v43 }
 0x160   : > { %v803_v12 = vpop.eup %802  ;;  %v499_v13 = vadd.f32 0.5, %v483_v7  ;;  %v1253_v17 = vpop.f32.mrb[10].mxu0 }
 0x161   : > { %v447_v15 = vmul.f32 0.5, %v359_v8  ;;  %v455_v16 = vmul.f32 0.5, %v407_v0  ;;  %v1255_v18 = vpop.f32.mrb[10].mxu1  ;;  %v805_v19 = vpop.eup %804  ;;  %v507_v20 = vsub.f32 %v491_v10, %v1140_v49  ;;  %v476_v22 = vmul.f32 0.5, %v803_v12 }
 0x162   : > { %v364_v24 = vpop.f32.mrb[11].mxu0  ;;  %v412_v26 = vpop.f32.mrb[11].mxu1  ;;  %v515_v27 = vsub.f32 %v499_v13, %v1143_v50  ;;  %v484_v28 = vmul.f32 0.5, %v805_v19  ;;  %v399_v8 = vadd.f32 %v1230_v33, %v1226_v25 }
 0x163   : > { %814 = vtanh.f32 %v447_v15  ;;  %v365_v29 = vadd.f32 %v364_v24, %v1220_v6  ;;  %v523_v30 = vmul.f32 %v507_v20, %v427_v47  ;;  %v492_v31 = vadd.f32 0.5, %v476_v22 }
 0x164   : > { %816 = vtanh.f32 %v455_v16  ;;  %v807_v35 = vpop.eup %806  ;;  %v531_v36 = vmul.f32 %v515_v27, %v435_v9  ;;  %v500_v37 = vadd.f32 0.5, %v484_v28  ;;  %v1263_v40 = vpop.f32.mrb[12].mxu0  ;;  %v413_v48 = vadd.f32 %v412_v26, %v1220_v6 }
 0x165   : > { %v448_v39 = vmul.f32 0.5, %v365_v29  ;;  %v1265_v41 = vpop.f32.mrb[12].mxu1  ;;  %v809_v42 = vpop.eup %808  ;;  %v539_v43 = vadd.f32 %v523_v30, %v1140_v49  ;;  %v508_v46 = vsub.f32 %v492_v31, %v1150_v51  ;;  %v477_v47 = vmul.f32 0.5, %v807_v35 }
 0x166   : > { %v370_v2 = vpop.f32.mrb[13].mxu0  ;;  %v418_v3 = vpop.f32.mrb[13].mxu1  ;;  %v547_v4 = vadd.f32 %v531_v36, %v1143_v50  ;;  %v516_v5 = vsub.f32 %v500_v37, %v1153_v52  ;;  %v485_v32 = vmul.f32 0.5, %v809_v42  ;;  %v456_v0 = vmul.f32 0.5, %v413_v48 }
 0x167   : > { %818 = vtanh.f32 %v448_v39  ;;  %555 = vst [vmem:[%s1274_s4] sm:$0xff] %v539_v43  ;;  %v524_v49 = vmul.f32 %v508_v46, %v428_v14  ;;  %v493_v7 = vadd.f32 0.5, %v477_v47  ;;  %v371_v12 = vadd.f32 %v370_v2, %v1220_v6 }
 0x168   : > { %v811_v9 = vpop.eup %810  ;;  %563 = vst [vmem:[%s1274_s4 + $0x40] sm:$0xff] %v547_v4  ;;  %v532_v10 = vmul.f32 %v516_v5, %v436_v21  ;;  %v501_v50 = vadd.f32 0.5, %v485_v32  ;;  %v1281_v13 = vpop.f32.mrb[14].mxu0  ;;  %820 = vtanh.f32 %v456_v0  ;;  %v357_v27 = vadd.f32 %v1239_v44, %v1226_v25 }
 0x169   : > { %v1283_v15 = vpop.f32.mrb[14].mxu1  ;;  %v813_v16 = vpop.eup %812  ;;  %v540_v14 = vadd.f32 %v524_v49, %v1150_v51  ;;  %v509_v19 = vsub.f32 %v493_v7, %v1160_v53  ;;  %v478_v33 = vmul.f32 0.5, %v811_v9  ;;  %v405_v51 = vadd.f32 %v1241_v45, %v1226_v25 }
 0x16a   : > { %v376_v20 = vpop.f32.mrb[15].mxu0  ;;  %v424_v22 = vpop.f32.mrb[15].mxu1  ;;  %v548_v21 = vadd.f32 %v532_v10, %v1153_v52  ;;  %v517_v24 = vsub.f32 %v501_v50, %v1163_v54  ;;  %v486_v26 = vmul.f32 0.5, %v813_v16  ;;  %v449_v30 = vmul.f32 0.5, %v371_v12 }
 0x16b   : > { %556 = vst [vmem:[%s1274_s4 + $0x8] sm:$0xff] %v540_v14  ;;  %v525_v28 = vmul.f32 %v509_v19, %v429_v23  ;;  %v494_v29 = vadd.f32 0.5, %v478_v33  ;;  %v438_v36 = vmax.f32 %v399_v8, 0.0  ;;  %v419_v52 = vadd.f32 %v418_v3, %v1220_v6 }
 0x16c   : > { %564 = vst [vmem:[%s1274_s4 + $0x48] sm:$0xff] %v548_v21  ;;  %v533_v35 = vmul.f32 %v517_v24, %v437_v34  ;;  %v502_v37 = vadd.f32 0.5, %v486_v26  ;;  %822 = vtanh.f32 %v449_v30  ;;  %v431_v47 = vmax.f32 %v357_v27, 0.0 }
 0x16d   : > { %v815_v31 = vpop.eup %814  ;;  %v541_v39 = vadd.f32 %v525_v28, %v1160_v53  ;;  %v510_v44 = vsub.f32 %v494_v29, %v1170_v55  ;;  %v457_v46 = vmul.f32 0.5, %v419_v52  ;;  %v439_v48 = vmax.f32 %v405_v51, 0.0 }
 0x16e   : > { %v817_v38 = vpop.eup %816  ;;  %v479_v23 = vmul.f32 0.5, %v815_v31  ;;  %v549_v42 = vadd.f32 %v533_v35, %v1163_v54  ;;  %v518_v45 = vsub.f32 %v502_v37, %v1173_v56  ;;  %v377_v5 = vadd.f32 %v376_v20, %v1220_v6 }
 0x16f   : > { %v487_v43 = vmul.f32 0.5, %v817_v38  ;;  %557 = vst [vmem:[%s1274_s4 + $0x10] sm:$0xff] %v541_v39  ;;  %v526_v34 = vmul.f32 %v510_v44, %v430_v11  ;;  %824 = vtanh.f32 %v457_v46  ;;  %v363_v49 = vadd.f32 %v1253_v17, %v1226_v25 }
 0x170   : > { %v495_v2 = vadd.f32 0.5, %v479_v23  ;;  %565 = vst [vmem:[%s1274_s4 + $0x50] sm:$0xff] %v549_v42  ;;  %v534_v4 = vmul.f32 %v518_v45, %v438_v36  ;;  %v450_v9 = vmul.f32 0.5, %v377_v5  ;;  %v425_v10 = vadd.f32 %v424_v22, %v1220_v6 }
 0x171   : > { %v819_v3 = vpop.eup %818  ;;  %v503_v53 = vadd.f32 0.5, %v487_v43  ;;  %v542_v54 = vadd.f32 %v526_v34, %v1170_v55  ;;  %v411_v55 = vadd.f32 %v1255_v18, %v1226_v25  ;;  %v432_v19 = vmax.f32 %v363_v49, 0.0 }
 0x172   : > { %v511_v32 = vsub.f32 %v495_v2, %v1180_v57  ;;  %v480_v7 = vmul.f32 0.5, %v819_v3  ;;  %v550_v8 = vadd.f32 %v534_v4, %v1173_v56  ;;  %v821_v50 = vpop.eup %820  ;;  %826 = vtanh.f32 %v450_v9 }
 0x173   : > { %v519_v0 = vsub.f32 %v503_v53, %v1183_v58  ;;  %558 = vst [vmem:[%s1274_s4 + $0x18] sm:$0xff] %v542_v54  ;;  %v488_v17 = vmul.f32 0.5, %v821_v50  ;;  %v458_v14 = vmul.f32 0.5, %v425_v10  ;;  %v440_v21 = vmax.f32 %v411_v55, 0.0 }
 0x174   : > { %v527_v11 = vmul.f32 %v511_v32, %v431_v47  ;;  %v496_v12 = vadd.f32 0.5, %v480_v7  ;;  %566 = vst [vmem:[%s1274_s4 + $0x58] sm:$0xff] %v550_v8  ;;  %v369_v26 = vadd.f32 %v1263_v40, %v1226_v25  ;;  %v375_v39 = vadd.f32 %v1281_v13, %v1226_v25 }
 0x175   : > { %v535_v16 = vmul.f32 %v519_v0, %v439_v48  ;;  %v504_v20 = vadd.f32 0.5, %v488_v17  ;;  %828 = vtanh.f32 %v458_v14  ;;  %v423_v42 = vadd.f32 %v1283_v15, %v1226_v25 }
 0x176   : > { %v543_v56 = vadd.f32 %v527_v11, %v1180_v57  ;;  %v512_v33 = vsub.f32 %v496_v12, %v1190_v59  ;;  %v823_v22 = vpop.eup %822  ;;  %v433_v35 = vmax.f32 %v369_v26, 0.0  ;;  %v434_v34 = vmax.f32 %v375_v39, 0.0 }
 0x177   : > { %v551_v6 = vadd.f32 %v535_v16, %v1183_v58  ;;  %v520_v24 = vsub.f32 %v504_v20, %v1193_v60  ;;  %v481_v57 = vmul.f32 0.5, %v823_v22  ;;  %v417_v58 = vadd.f32 %v1265_v41, %v1226_v25 }
 0x178   : > { %559 = vst [vmem:[%s1274_s4 + $0x20] sm:$0xff] %v543_v56  ;;  %v528_v18 = vmul.f32 %v512_v33, %v432_v19  ;;  %v442_v48 = vmax.f32 %v423_v42, 0.0 }
 0x179   : > { %567 = vst [vmem:[%s1274_s4 + $0x60] sm:$0xff] %v551_v6  ;;  %v825_v28 = vpop.eup %824  ;;  %v536_v29 = vmul.f32 %v520_v24, %v440_v21  ;;  %v497_v51 = vadd.f32 0.5, %v481_v57 }
 0x17a   : > { %v544_v27 = vadd.f32 %v528_v18, %v1190_v59  ;;  %v489_v30 = vmul.f32 0.5, %v825_v28  ;;  %v441_v59 = vmax.f32 %v417_v58, 0.0 }
 0x17b   : > { %v552_v31 = vadd.f32 %v536_v29, %v1193_v60  ;;  %v513_v36 = vsub.f32 %v497_v51, %v1200_v61 }
 0x17c   : > { %560 = vst [vmem:[%s1274_s4 + $0x28] sm:$0xff] %v544_v27  ;;  %v505_v37 = vadd.f32 0.5, %v489_v30  ;;  %v827_v52 = vpop.eup %826 }
 0x17d   : > { %568 = vst [vmem:[%s1274_s4 + $0x68] sm:$0xff] %v552_v31  ;;  %v529_v40 = vmul.f32 %v513_v36, %v433_v35  ;;  %v482_v44 = vmul.f32 0.5, %v827_v52 }
 0x17e   : > { %v521_v38 = vsub.f32 %v505_v37, %v1203_v62 }
 0x17f   : > { %v829_v41 = vpop.eup %828  ;;  %v545_v60 = vadd.f32 %v529_v40, %v1200_v61  ;;  %v498_v45 = vadd.f32 0.5, %v482_v44 }
 0x180   : > { %v537_v23 = vmul.f32 %v521_v38, %v441_v59  ;;  %v490_v43 = vmul.f32 0.5, %v829_v41 }
 0x181   : > { %561 = vst [vmem:[%s1274_s4 + $0x30] sm:$0xff] %v545_v60  ;;  %v514_v13 = vsub.f32 %v498_v45, %v1210_v63 }
 0x182   : > { %v553_v46 = vadd.f32 %v537_v23, %v1203_v62  ;;  %v506_v47 = vadd.f32 0.5, %v490_v43 }
 0x183   : > { %v530_v61 = vmul.f32 %v514_v13, %v434_v34 }
 0x184   : > { %569 = vst [vmem:[%s1274_s4 + $0x70] sm:$0xff] %v553_v46  ;;  %v522_v2 = vsub.f32 %v506_v47, %v1213_v1 }
 0x185   : > { %v546_v25 = vadd.f32 %v530_v61, %v1210_v63 }
 0x186   : > { %v538_v15 = vmul.f32 %v522_v2, %v442_v48 }
 0x187   : > { %562 = vst [vmem:[%s1274_s4 + $0x38] sm:$0xff] %v546_v25 }
 0x188   : > { %v554_v62 = vadd.f32 %v538_v15, %v1213_v1 }
 0x18a   : > { %570 = vst [vmem:[%s1274_s4 + $0x78] sm:$0xff] %v554_v62 }
 0x18b   : > { %901 = shalt.err (!%p898_p7)
}
 0x18c   : > { %s902_s30 = scalar_lea.hbm %s1346_s11, 2048  ;;  %s906_s8 = scalar_lea.hbm %s1397_s3, 8192 }
 0x18d   : > { %p903_p9 = scmp.ne.s32.totalorder %s1346_s11, %s902_s30  ;;  %p907_p5 = scmp.lt.u32.totalorder %s1346_s11, %s1397_s3 }
 0x18e   : > { %p908_p10 = scmp.lt.u32.totalorder %s906_s8, %s902_s30  ;;  %p910_p1 = scmp.lt.u32.totalorder %s902_s30, %s1346_s11 }
 0x18f   : > { %p904_p11 = pnand %p903_p9, %p1073_p12 }
 0x190   : > { %p909_p2 = por %p908_p10, %p907_p5 }
 0x191   : > { %p905_p0 = pneg %p904_p11 }
 0x192   : > { %p911_p4 = por %p910_p1, %p909_p2 }
 0x194   : > { %p912_p6 = pnand %p911_p4, %p905_p0 }
 0x196   : > { %915 = shalt.err (!%p912_p6)
}
 0x197   : > { %s968_s20 = smov 128   ;;  %s969_s4 = smov 8  }
 0x198   : > { %740 = dma.vmem_to_hbm [thread:$0]  (%p1073_p12), %s1348_s26, 2048, %s1346_s11, %s572_s27, %s968_s20, %s968_s20, %s969_s4  }
 0x199 PF: > { %p757_p8 = scmp.ge.s32.totalorder %s958_s15, 2  ;;  %s600_s25 = sand.u32 1, %s946_s12  }
 0x19a   : > { %p1412_p13 = scmp.ne.s32.totalorder %s1402_s19, 0  ;;  %s601_s5 = scalar_lea.sflag [#allocation4], %s600_s25 }
 0x19c   : > { %p751_p3 = pnand %p757_p8, %p1412_p13 }
 0x19e   : > { %941 = dma.done.wait (!%p751_p3), %s601_s5, 2048  }
 0x19f   : > { %943 = vsyncadd (!%p751_p3), %s601_s5, 4294965248  ;;  %p17_p7 = scmp.ge.s32.totalorder %s1043_s24, 6   ;;  %s1413_s12 = smov %s950_s13 }
 0x1a0   : > { %s1414_s13 = smov %s954_s14  ;;  %s1415_s14 = smov %s1069_s17 }
 0x1a1   : > { %s1416_s15 = smov %s1043_s24  ;;  %19 = sbr.rel (!%p17_p7) target bundleno = 6 (0x6), region = 81 }
 0x1a8   :  { %606 = vsyncpa [#allocation3], 1 }
 0x1a9   :  { %608 = vsyncpa [#allocation3 + $0x1], 1 }
 0x1aa   :  { %609 = vsyncpa [#allocation6], 1 }
 0x1ab   :  { %610 = vsyncpa [#allocation4], 1 }
 0x1ac   :  { %612 = vsyncpa [#allocation4 + $0x1], 1 }

// kernel: tpu_custom_call.1
= control target key start
LH: loop header
LB: loop body
LE: loop exit
PB: predicated region body
PF: predicated region fallthrough
CT: control target
= control target key end

     0   :  { %8 = vsyncpa [#allocation3], 0  ;;  %s1394_s0 = inlined_call_operand.hbm [shape: f32[512,128], index: 0, kind: input, shape index: {}]   ;;  %s1395_s1 = inlined_call_operand.hbm [shape: f32[128,256], index: 1, kind: input, shape index: {}]   ;;  %s1396_s2 = inlined_call_operand.vmem [shape: f32[1,256], index: 2, kind: input, shape index: {}]   ;;  %s1397_s3 = inlined_call_operand.hbm [shape: f32[512,128], index: 3, kind: output, shape index: {}]  }
   0x1   :  { %10 = vsyncpa [#allocation3 + $0x1], 0 }
   0x2   :  { %11 = vsyncpa [#allocation6], 0 }
   0x3   :  { %12 = vsyncpa [#allocation4], 0 }
   0x4   :  { %14 = vsyncpa [#allocation4 + $0x1], 0  ;;  %s990_s12 = smov 0   ;;  %s992_s13 = smov 0  }
   0x5   :  { %s994_s14 = smov 0   ;;  %s996_s15 = smov 0  }
   0x6 LB: > { %s1011_s16 = sadd.s32 4294967295, %s958_s15   ;;  %s668_s17 = sadd.s32 4294967294, %s958_s15   ;;  %s958_s15 = sphi %s996_s15, %s1416_s15   ;;  %s954_s14 = sphi %s994_s14, %s1415_s14   ;;  %s950_s13 = sphi %s992_s13, %s1414_s13   ;;  %s946_s12 = sphi %s990_s12, %s1413_s12  }
   0x7   : > { %p40_p0 = scmp.ne.s32.totalorder %s950_s13, %s946_s12  ;;  %p1398_p1 = scmp.eq.s32.totalorder %s1011_s16, 0 }
   0x8   : > { %p112_p3 = scmp.eq.s32.totalorder %s668_s17, 3  ;;  %p669_p5 = scmp.ge.s32.totalorder %s958_s15, 1 }
   0x9   : > { %p1020_p4 = por %p1398_p1, %p40_p0  ;;  %p119_p7 = scmp.lt.s32.totalorder %s958_s15, 5 }
   0xa   : > { %p1025_p6 = por %p112_p3, %p40_p0  ;;  %s960_s21 = smov [#allocation5]  }
   0xb   : > { %s1401_s18 = scalar_select %p1020_p4, 1, 0 }
   0xc   : > { %s1402_s19 = scalar_select %p1025_p6, 1, 0 }
   0xd   : > { %p1030_p8 = pnand %p669_p5, %p119_p7  ;;  %s131_s22 = sshll.u32 %s960_s21, 4  ;;  %s132_s22 = int_to_ptr.vmem [resolvable:$true] %s131_s22 }
   0xe   : > { %s1043_s24 = sadd.s32 1, %s958_s15   ;;  %s27_s25 = sadd.s32 1, %s954_s14 }
   0xf   : > { %s1403_s20 = scalar_select %p1030_p8, 1, 0 }
  0x10   : > { %p742_p9 = pneg %p1030_p8  ;;  %s24_s26 = ssub.s32 %s958_s15, %s1043_s24 }
  0x11   : > { %s830_s29 = scalar_lea.hbm %s1395_s1, 4096 }
  0x12   : > { %p1038_p10 = pnand %p742_p9, %p1398_p1  ;;  %p831_p11 = scmp.ne.s32.totalorder %s1395_s1, %s830_s29 }
  0x13   : > { %p837_p3 = scmp.lt.u32.totalorder %s830_s29, %s1395_s1 }
  0x14   : > { %p832_p12 = pneg %p1038_p10 }
  0x16   : > { %p833_p13 = pnand %p832_p12, %p831_p11 }
  0x18   : > { %p834_p0 = pneg %p833_p13 }
  0x1a   : > { %p839_p5 = pnand %p837_p3, %p834_p0 }
  0x1c   : > { %842 = shalt.err (!%p839_p5)
}
  0x1d   : > { %s843_s7 = scalar_lea.vmem %s132_s22, 4096  ;;  %p851_p2 = scmp.lt.s32.totalorder %s132_s22, %s132_s22 }
  0x1e   : > { %p844_p7 = scmp.ne.s32.totalorder %s132_s22, %s843_s7  ;;  %p852_p6 = scmp.lt.s32.totalorder %s843_s7, %s843_s7 }
  0x20   : > { %p846_p9 = pnand %p844_p7, %p832_p12  ;;  %p853_p4 = por %p852_p6, %p851_p2 }
  0x22   : > { %p847_p1 = pneg %p846_p9 }
  0x24   : > { %p854_p8 = pnand %p853_p4, %p847_p1 }
  0x26   : > { %857 = shalt.err (!%p854_p8)
}
  0x27   : > { %s961_s8 = smov 256   ;;  %s962_s9 = smov 16  }
  0x28   : > { %745 = dma.hbm_to_vmem [thread:$0]  (!%p1038_p10), %s1395_s1, 4096, %s132_s22, [#allocation6], %s961_s8, %s961_s8, %s962_s9  }
  0x29   : > { %p25_p11 = scmp.eq.s32.totalorder %s24_s26, 0  ;;  %p34_p2 = scmp.ne.s32.totalorder %s954_s14, %s950_s13 }
  0x2a   : > { %p35_p1 = scmp.eq.s32.totalorder %s958_s15, 0  ;;  %p755_p4 = scmp.lt.s32.totalorder %s958_s15, 4 }
  0x2b   : > { %s1069_s17 = scalar_select %p25_p11, %s954_s14, %s27_s25  }
  0x2c   : > { %p36_p6 = por %p35_p1, %p34_p2  ;;  %p1405_p8 = scmp.eq.s32.totalorder %s1011_s16, 3 }
  0x2d   : > { %s148_s27 = sand.u32 1, %s954_s14   ;;  %s684_s28 = sshll.u32 %s958_s15, 11 }
  0x2e   : > { %p1073_p12 = por %p1405_p8, %p34_p2  ;;  %s672_s29 = sshll.u32 %s148_s27, 7 }
  0x2f   : > { %s1082_s4 = scalar_lea.hbm %s1394_s0, %s684_s28  ;;  %s152_s22 = scalar_lea.vmem [#allocation2], %s672_s29 }
  0x30   : > { %s159_s25 = sshll.u32 %s152_s22, 4  ;;  %p1084_p10 = pnand %p755_p4, %p36_p6  ;;  %s1088_s25 = int_to_ptr.vmem [resolvable:$true] %s159_s25 }
  0x31   : > { %s1090_s5 = scalar_lea.sflag [#allocation3], %s148_s27  ;;  %s858_s6 = scalar_lea.hbm %s1082_s4, 2048 }
  0x32   : > { %p859_p13 = scmp.ne.s32.totalorder %s1082_s4, %s858_s6  ;;  %p860_p0 = pneg %p1084_p10 }
  0x33   : > { %s863_s9 = scalar_lea.hbm %s1394_s0, 8192  ;;  %p864_p7 = scmp.lt.u32.totalorder %s1082_s4, %s1394_s0 }
  0x34   : > { %p861_p3 = pnand %p860_p0, %p859_p13  ;;  %p865_p9 = scmp.lt.u32.totalorder %s863_s9, %s858_s6 }
  0x35   : > { %p867_p2 = scmp.lt.u32.totalorder %s858_s6, %s1082_s4 }
  0x36   : > { %p862_p5 = pneg %p861_p3  ;;  %p866_p11 = por %p865_p9, %p864_p7 }
  0x38   : > { %p868_p1 = por %p867_p2, %p866_p11 }
  0x3a   : > { %p869_p4 = pnand %p868_p1, %p862_p5 }
  0x3c   : > { %872 = shalt.err (!%p869_p4)
}
  0x3d   : > { %s873_s27 = scalar_lea.vmem %s1088_s25, 2048  ;;  %s963_s28 = smov [#allocation2]  }
  0x3e   : > { %p874_p6 = scmp.ne.s32.totalorder %s1088_s25, %s873_s27  ;;  %s878_s29 = sshll.u32 %s963_s28, 4  ;;  %s879_s29 = int_to_ptr.vmem [resolvable:$false] %s878_s29 }
  0x3f   : > { %s880_s23 = scalar_lea.vmem %s879_s29, 4096  ;;  %p881_p3 = scmp.lt.s32.totalorder %s1088_s25, %s879_s29 }
  0x40   : > { %p876_p8 = pnand %p874_p6, %p860_p0  ;;  %p882_p7 = scmp.lt.s32.totalorder %s880_s23, %s873_s27 }
  0x42   : > { %p877_p13 = pneg %p876_p8  ;;  %p883_p9 = por %p882_p7, %p881_p3 }
  0x44   : > { %p884_p11 = pnand %p883_p9, %p877_p13 }
  0x46   : > { %887 = shalt.err (!%p884_p11)
}
  0x47   : > { %s964_s30 = smov 128   ;;  %s965_s22 = smov 8  }
  0x48   : > { %749 = dma.hbm_to_vmem [thread:$0]  (!%p1084_p10), %s1082_s4, 2048, %s1088_s25, %s1090_s5, %s964_s30, %s964_s30, %s965_s22  }
  0x49   : > { %p1408_p0 = scmp.ne.s32.totalorder %s1403_s20, 0 }
  0x4a   : > { %s1121_s6 = sand.u32 (!%p1408_p0), 1, %s950_s13   ;;  %p1409_p5 = scmp.ne.s32.totalorder (!%p1408_p0), %s1401_s18, 0 }
  0x4b   : > { %171 = sbr.rel (%p1408_p0) target bundleno = 409 (0x199), region = 32  ;;  %s676_s7 = sshll.u32 (!%p1408_p0), %s1121_s6, 7 }
  0x4c   : > { %s174_s8 = scalar_lea.sflag (!%p1408_p0), [#allocation3], %s1121_s6  ;;  %s1127_s9 = scalar_lea.vmem (!%p1408_p0), [#allocation2], %s676_s7 }
  0x52   : > { %933 = dma.done.wait (%p1409_p5), %s174_s8, 2048  }
  0x53   : > { %935 = vsyncadd (%p1409_p5), %s174_s8, 4294965248  ;;  %p1410_p10 = scmp.eq.s32.totalorder %s1011_s16, 0 }
  0x55   : > { %937 = dma.done.wait (%p1410_p10), [#allocation6], 4096   ;;  %p1411_p2 = pmov %p1410_p10 }
  0x56   : > { %v966_v0 = vmov 0.0   ;;  %v223_v1 = vld [vmem:[#allocation5 + $0x8] sm:$0xff]  ;;  %v225_v2 = vld [vmem:[#allocation5 + $0x18] sm:$0xff]  ;;  %v222_v3 = vld [vmem:[#allocation5] sm:$0xff]  ;;  %s1274_s4 = scalar_lea.vmem [#allocation7], %s676_s7  ;;  %s685_s25 = sshll.u32 %s1011_s16, 11 }
  0x57   : > { %939 = vsyncadd (%p1411_p2), [#allocation6], 4294963200  ;;  %330 = vmatprep.mubr.f32.mxu0 %v966_v0  ;;  %378 = vmatprep.mubr.f32.mxu1 %v966_v0  ;;  %v686_v4 = vpack.c.bf16 %v225_v2, %v223_v1  ;;  %v224_v5 = vld [vmem:[#allocation5 + $0x10] sm:$0xff]  ;;  %v227_v6 = vld [vmem:[#allocation5 + $0x28] sm:$0xff]  ;;  %v256_v2 = vlaneseq  ;;  %s585_s26 = sshll.u32 %s1274_s4, 4  ;;  %s1346_s11 = scalar_lea.hbm %s1397_s3, %s685_s25  ;;  %s1348_s26 = int_to_ptr.vmem [resolvable:$true] %s585_s26 }
  0x58   : > { %v229_v7 = vld [vmem:[#allocation5 + $0x38] sm:$0xff]  ;;  %v688_v8 = vpack.c.bf16 %v224_v5, %v222_v3  ;;  %v226_v10 = vld [vmem:[#allocation5 + $0x20] sm:$0xff]  ;;  %v228_v11 = vld [vmem:[#allocation5 + $0x30] sm:$0xff]  ;;  %s572_s27 = scalar_lea.sflag [#allocation4], %s1121_s6  ;;  %s888_s16 = scalar_lea.vmem %s1348_s26, 2048 }
  0x59   : > { %v690_v9 = vpack.c.bf16 %v229_v7, %v227_v6  ;;  %v231_v12 = vld [vmem:[#allocation5 + $0x48] sm:$0xff]  ;;  %687 = vmatprep.subr.bf16.mxu0 %v686_v4  ;;  %718 = vmatprep.subr.bf16.mxu1 %v686_v4  ;;  %v233_v13 = vld [vmem:[#allocation5 + $0x58] sm:$0xff]  ;;  %v692_v14 = vpack.c.bf16 %v228_v11, %v226_v10  ;;  %v230_v16 = vld [vmem:[#allocation5 + $0x40] sm:$0xff]  ;;  %v257_v3 = vshrl.u32 %v256_v2, 7  ;;  %p889_p1 = scmp.ne.s32.totalorder %s1348_s26, %s888_s16  ;;  %s967_s28 = smov [#allocation7]  }
  0x5a   : > { %689 = vmatpush1.bf16.msra.mxu0 %v688_v8  ;;  %726 = vmatpush1.bf16.msra.mxu1 %v688_v8  ;;  %v694_v15 = vpack.c.bf16 %v233_v13, %v231_v12  ;;  %v232_v17 = vld [vmem:[#allocation5 + $0x50] sm:$0xff]  ;;  %v235_v18 = vld [vmem:[#allocation5 + $0x68] sm:$0xff]  ;;  %v237_v19 = vld [vmem:[#allocation5 + $0x78] sm:$0xff]  ;;  %s892_s29 = sshll.u32 %s967_s28, 4  ;;  %s893_s29 = int_to_ptr.vmem [resolvable:$false] %s892_s29 }
  0x5b   : > { %691 = vmatprep.subr.bf16.mxu0 %v690_v9  ;;  %719 = vmatprep.subr.bf16.mxu1 %v690_v9  ;;  %v696_v20 = vpack.c.bf16 %v232_v17, %v230_v16  ;;  %v698_v21 = vpack.c.bf16 %v237_v19, %v235_v18  ;;  %v234_v22 = vld [vmem:[#allocation5 + $0x60] sm:$0xff]  ;;  %v236_v23 = vld [vmem:[#allocation5 + $0x70] sm:$0xff]  ;;  %v239_v24 = vld [vmem:[#allocation5 + $0x88] sm:$0xff]  ;;  %v262_v4 = vsub.s32 1, %v257_v3  ;;  %v258_v16 = vsub.s32 0, %v257_v3  ;;  %p890_p4 = pnand %p889_p1, %p1073_p12  ;;  %s894_s23 = scalar_lea.vmem %s893_s29, 4096 }
  0x5c   : > { %v241_v25 = vld [vmem:[#allocation5 + $0x98] sm:$0xff]  ;;  %v700_v26 = vpack.c.bf16 %v236_v23, %v234_v22  ;;  %v238_v28 = vld [vmem:[#allocation5 + $0x80] sm:$0xff]  ;;  %v240_v29 = vld [vmem:[#allocation5 + $0x90] sm:$0xff]  ;;  %p895_p8 = scmp.lt.s32.totalorder %s1348_s26, %s893_s29  ;;  %p896_p13 = scmp.lt.s32.totalorder %s894_s23, %s888_s16 }
  0x5d   : > { %v702_v27 = vpack.c.bf16 %v241_v25, %v239_v24  ;;  %v243_v30 = vld [vmem:[#allocation5 + $0xa8] sm:$0xff]  ;;  %v245_v31 = vld [vmem:[#allocation5 + $0xb8] sm:$0xff]  ;;  %v704_v32 = vpack.c.bf16 %v240_v29, %v238_v28  ;;  %v242_v34 = vld [vmem:[#allocation5 + $0xa0] sm:$0xff]  ;;  %p891_p6 = pneg %p890_p4 }
  0x5e   : > { %693 = vmatpush1.bf16.msra.mxu0 %v692_v14  ;;  %727 = vmatpush1.bf16.msra.mxu1 %v692_v14  ;;  %v706_v33 = vpack.c.bf16 %v245_v31, %v243_v30  ;;  %v244_v35 = vld [vmem:[#allocation5 + $0xb0] sm:$0xff]  ;;  %v247_v36 = vld [vmem:[#allocation5 + $0xc8] sm:$0xff]  ;;  %v249_v37 = vld [vmem:[#allocation5 + $0xd8] sm:$0xff]  ;;  %p897_p3 = por %p896_p13, %p895_p8 }
  0x5f   : > { %695 = vmatprep.subr.bf16.mxu0 %v694_v15  ;;  %720 = vmatprep.subr.bf16.mxu1 %v694_v15  ;;  %v708_v38 = vpack.c.bf16 %v244_v35, %v242_v34  ;;  %v710_v39 = vpack.c.bf16 %v249_v37, %v247_v36  ;;  %v246_v40 = vld [vmem:[#allocation5 + $0xc0] sm:$0xff]  ;;  %v248_v41 = vld [vmem:[#allocation5 + $0xd0] sm:$0xff]  ;;  %v251_v42 = vld [vmem:[#allocation5 + $0xe8] sm:$0xff] }
  0x60   : > { %v253_v43 = vld [vmem:[#allocation5 + $0xf8] sm:$0xff]  ;;  %v712_v44 = vpack.c.bf16 %v248_v41, %v246_v40  ;;  %v250_v46 = vld [vmem:[#allocation5 + $0xe0] sm:$0xff]  ;;  %v252_v47 = vld [vmem:[#allocation5 + $0xf0] sm:$0xff]  ;;  %p898_p7 = pnand %p897_p3, %p891_p6 }
  0x61   : > { %v714_v45 = vpack.c.bf16 %v253_v43, %v251_v42  ;;  %v716_v48 = vpack.c.bf16 %v252_v47, %v250_v46  ;;  %v1140_v49 = vld [vmem:[%s1127_s9] sm:$0xff]  ;;  %v1150_v51 = vld [vmem:[%s1127_s9 + $0x8] sm:$0xff]  ;;  %v1160_v53 = vld [vmem:[%s1127_s9 + $0x10] sm:$0xff] }
  0x62   : > { %697 = vmatpush1.bf16.msra.mxu0 %v696_v20  ;;  %728 = vmatpush1.bf16.msra.mxu1 %v696_v20  ;;  %v1143_v50 = vld [vmem:[%s1127_s9 + $0x40] sm:$0xff]  ;;  %v1153_v52 = vld [vmem:[%s1127_s9 + $0x48] sm:$0xff]  ;;  %v1163_v54 = vld [vmem:[%s1127_s9 + $0x50] sm:$0xff] }
  0x63   : > { %699 = vmatprep.subr.bf16.mxu0 %v698_v21  ;;  %721 = vmatprep.subr.bf16.mxu1 %v698_v21  ;;  %v1170_v55 = vld [vmem:[%s1127_s9 + $0x18] sm:$0xff]  ;;  %v1180_v57 = vld [vmem:[%s1127_s9 + $0x20] sm:$0xff]  ;;  %v1190_v59 = vld [vmem:[%s1127_s9 + $0x28] sm:$0xff] }
  0x64   : > { %v1173_v56 = vld [vmem:[%s1127_s9 + $0x58] sm:$0xff]  ;;  %v1183_v58 = vld [vmem:[%s1127_s9 + $0x60] sm:$0xff]  ;;  %v1193_v60 = vld [vmem:[%s1127_s9 + $0x68] sm:$0xff] }
  0x65   : > { %v1200_v61 = vld [vmem:[%s1127_s9 + $0x30] sm:$0xff]  ;;  %v1210_v63 = vld [vmem:[%s1127_s9 + $0x38] sm:$0xff]  ;;  %v254_v5 = vld [vmem:[%s1396_s2] sm:$0x3] }
  0x66   : > { %701 = vmatpush1.bf16.msra.mxu0 %v700_v26  ;;  %729 = vmatpush1.bf16.msra.mxu1 %v700_v26  ;;  %v1203_v62 = vld [vmem:[%s1127_s9 + $0x70] sm:$0xff]  ;;  %v1213_v1 = vld [vmem:[%s1127_s9 + $0x78] sm:$0xff]  ;;  %v1220_v6 = vrot.slane %v254_v5, %v262_v4  ;;  %v1226_v25 = vrot.slane %v254_v5, %v258_v16 }
  0x67   : > { %703 = vmatprep.subr.bf16.mxu0 %v702_v27  ;;  %722 = vmatprep.subr.bf16.mxu1 %v702_v27 }
  0x6a   : > { %705 = vmatpush1.bf16.msra.mxu0 %v704_v32  ;;  %730 = vmatpush1.bf16.msra.mxu1 %v704_v32 }
  0x6b   : > { %707 = vmatprep.subr.bf16.mxu0 %v706_v33  ;;  %723 = vmatprep.subr.bf16.mxu1 %v706_v33 }
  0x6e   : > { %709 = vmatpush1.bf16.msra.mxu0 %v708_v38  ;;  %731 = vmatpush1.bf16.msra.mxu1 %v708_v38 }
  0x6f   : > { %711 = vmatprep.subr.bf16.mxu0 %v710_v39  ;;  %724 = vmatprep.subr.bf16.mxu1 %v710_v39 }
  0x72   : > { %713 = vmatpush1.bf16.msra.mxu0 %v712_v44  ;;  %732 = vmatpush1.bf16.msra.mxu1 %v712_v44 }
  0x73   : > { %715 = vmatprep.subr.bf16.mxu0 %v714_v45  ;;  %725 = vmatprep.subr.bf16.mxu1 %v714_v45 }
  0x76   : > { %717 = vmatpush1.bf16.msra.mxu0 %v716_v48  ;;  %733 = vmatpush1.bf16.msra.mxu1 %v716_v48 }
  0x79   : > { %331 = vmatmul.mubr.f32.vlgmr.msra.gmra.mrb[0].mxu0 %v1140_v49  ;;  %379 = vmatmul.mubr.f32.vlgmr.msra.gmra.mrb[0].mxu1 %v1143_v50 }
  0x7a   : > { %336 = vmatprep.mubr.f32.mxu0 %v966_v0  ;;  %384 = vmatprep.mubr.f32.mxu1 %v966_v0 }
  0x7d   : > { %337 = vmatmul.mubr.f32.gmra.mrb[2].mxu0 %v1150_v51  ;;  %385 = vmatmul.mubr.f32.gmra.mrb[2].mxu1 %v1153_v52 }
  0x7e   : > { %342 = vmatprep.mubr.f32.mxu0 %v966_v0  ;;  %390 = vmatprep.mubr.f32.mxu1 %v966_v0 }
  0x81   : > { %343 = vmatmul.mubr.f32.gmra.mrb[4].mxu0 %v1160_v53  ;;  %391 = vmatmul.mubr.f32.gmra.mrb[4].mxu1 %v1163_v54 }
  0x82   : > { %348 = vmatprep.mubr.f32.mxu0 %v966_v0  ;;  %396 = vmatprep.mubr.f32.mxu1 %v966_v0 }
  0x85   : > { %349 = vmatmul.mubr.f32.gmra.mrb[6].mxu0 %v1170_v55  ;;  %397 = vmatmul.mubr.f32.gmra.mrb[6].mxu1 %v1173_v56 }
  0x86   : > { %354 = vmatprep.mubr.f32.mxu0 %v966_v0  ;;  %402 = vmatprep.mubr.f32.mxu1 %v966_v0 }
  0x89   : > { %355 = vmatmul.mubr.f32.gmra.mrb[8].mxu0 %v1180_v57  ;;  %403 = vmatmul.mubr.f32.gmra.mrb[8].mxu1 %v1183_v58 }
  0x8a   : > { %360 = vmatprep.mubr.f32.mxu0 %v966_v0  ;;  %408 = vmatprep.mubr.f32.mxu1 %v966_v0 }
  0x8d   : > { %361 = vmatmul.mubr.f32.gmra.mrb[10].mxu0 %v1190_v59  ;;  %409 = vmatmul.mubr.f32.gmra.mrb[10].mxu1 %v1193_v60 }
  0x8e   : > { %366 = vmatprep.mubr.f32.mxu0 %v966_v0  ;;  %414 = vmatprep.mubr.f32.mxu1 %v966_v0 }
  0x91   : > { %367 = vmatmul.mubr.f32.gmra.mrb[12].mxu0 %v1200_v61  ;;  %415 = vmatmul.mubr.f32.gmra.mrb[12].mxu1 %v1203_v62 }
  0x92   : > { %372 = vmatprep.mubr.f32.mxu0 %v966_v0  ;;  %420 = vmatprep.mubr.f32.mxu1 %v966_v0 }
  0x95   : > { %373 = vmatmul.mubr.f32.gmra.mrb[14].mxu0 %v1210_v63  ;;  %421 = vmatmul.mubr.f32.gmra.mrb[14].mxu1 %v1213_v1 }
 0x14c   : > { %v332_v7 = vpop.f32.mrb[0].mxu0  ;;  %v380_v8 = vpop.f32.mrb[0].mxu1 }
 0x14d   : > { %v334_v0 = vpop.f32.mrb[1].mxu0  ;;  %v382_v9 = vpop.f32.mrb[1].mxu1  ;;  %v333_v34 = vadd.f32 %v332_v7, %v1226_v25  ;;  %v381_v39 = vadd.f32 %v380_v8, %v1226_v25 }
 0x14e   : > { %v335_v10 = vadd.f32 %v334_v0, %v1220_v6  ;;  %v383_v11 = vadd.f32 %v382_v9, %v1220_v6 }
 0x14f   : > { %v427_v47 = vmax.f32 %v333_v34, 0.0  ;;  %v435_v9 = vmax.f32 %v381_v39, 0.0 }
 0x150   : > { %v443_v12 = vmul.f32 0.5, %v335_v10  ;;  %v451_v13 = vmul.f32 0.5, %v383_v11  ;;  %v338_v14 = vpop.f32.mrb[2].mxu0  ;;  %v386_v15 = vpop.f32.mrb[2].mxu1 }
 0x151   : > { %v340_v17 = vpop.f32.mrb[3].mxu0  ;;  %v388_v18 = vpop.f32.mrb[3].mxu1  ;;  %v1237_v41 = vadd.f32 %v338_v14, %v1226_v25  ;;  %v387_v2 = vadd.f32 %v386_v15, %v1226_v25 }
 0x152   : > { %798 = vtanh.f32 %v443_v12  ;;  %v341_v19 = vadd.f32 %v340_v17, %v1220_v6  ;;  %v389_v20 = vadd.f32 %v388_v18, %v1220_v6 }
 0x153   : > { %800 = vtanh.f32 %v451_v13  ;;  %v428_v14 = vmax.f32 %v1237_v41, 0.0 }
 0x154   : > { %v444_v21 = vmul.f32 0.5, %v341_v19  ;;  %v452_v22 = vmul.f32 0.5, %v389_v20  ;;  %v344_v23 = vpop.f32.mrb[4].mxu0  ;;  %v392_v24 = vpop.f32.mrb[4].mxu1 }
 0x155   : > { %v346_v26 = vpop.f32.mrb[5].mxu0  ;;  %v394_v27 = vpop.f32.mrb[5].mxu1  ;;  %v1245_v3 = vadd.f32 %v344_v23, %v1226_v25  ;;  %v1250_v11 = vadd.f32 %v392_v24, %v1226_v25 }
 0x156   : > { %802 = vtanh.f32 %v444_v21  ;;  %v347_v28 = vadd.f32 %v346_v26, %v1220_v6  ;;  %v395_v29 = vadd.f32 %v394_v27, %v1220_v6  ;;  %v436_v21 = vmax.f32 %v387_v2, 0.0 }
 0x157   : > { %804 = vtanh.f32 %v452_v22  ;;  %v429_v23 = vmax.f32 %v1245_v3, 0.0  ;;  %v437_v34 = vmax.f32 %v1250_v11, 0.0 }
 0x158   : > { %v445_v30 = vmul.f32 0.5, %v347_v28  ;;  %v453_v31 = vmul.f32 0.5, %v395_v29  ;;  %v350_v32 = vpop.f32.mrb[6].mxu0  ;;  %v1230_v33 = vpop.f32.mrb[6].mxu1 }
 0x159   : > { %v352_v35 = vpop.f32.mrb[7].mxu0  ;;  %v400_v36 = vpop.f32.mrb[7].mxu1 }
 0x15a   : > { %806 = vtanh.f32 %v445_v30  ;;  %v353_v37 = vadd.f32 %v352_v35, %v1220_v6  ;;  %v401_v38 = vadd.f32 %v400_v36, %v1220_v6 }
 0x15b   : > { %808 = vtanh.f32 %v453_v31 }
 0x15c   : > { %v799_v40 = vpop.eup %798  ;;  %v446_v42 = vmul.f32 0.5, %v353_v37  ;;  %v454_v43 = vmul.f32 0.5, %v401_v38  ;;  %v1239_v44 = vpop.f32.mrb[8].mxu0  ;;  %v351_v38 = vadd.f32 %v350_v32, %v1226_v25 }
 0x15d   : > { %v1241_v45 = vpop.f32.mrb[8].mxu1  ;;  %v801_v46 = vpop.eup %800  ;;  %v475_v48 = vmul.f32 0.5, %v799_v40 }
 0x15e   : > { %v358_v4 = vpop.f32.mrb[9].mxu0  ;;  %v406_v5 = vpop.f32.mrb[9].mxu1  ;;  %v483_v7 = vmul.f32 0.5, %v801_v46  ;;  %810 = vtanh.f32 %v446_v42  ;;  %v430_v11 = vmax.f32 %v351_v38, 0.0 }
 0x15f   : > { %v359_v8 = vadd.f32 %v358_v4, %v1220_v6  ;;  %v407_v0 = vadd.f32 %v406_v5, %v1220_v6  ;;  %v491_v10 = vadd.f32 0.5, %v475_v48  ;;  %812 = vtanh.f32 %v454_v43 }
 0x160   : > { %v803_v12 = vpop.eup %802  ;;  %v499_v13 = vadd.f32 0.5, %v483_v7  ;;  %v1253_v17 = vpop.f32.mrb[10].mxu0 }
 0x161   : > { %v447_v15 = vmul.f32 0.5, %v359_v8  ;;  %v455_v16 = vmul.f32 0.5, %v407_v0  ;;  %v1255_v18 = vpop.f32.mrb[10].mxu1  ;;  %v805_v19 = vpop.eup %804  ;;  %v507_v20 = vsub.f32 %v491_v10, %v1140_v49  ;;  %v476_v22 = vmul.f32 0.5, %v803_v12 }
 0x162   : > { %v364_v24 = vpop.f32.mrb[11].mxu0  ;;  %v412_v26 = vpop.f32.mrb[11].mxu1  ;;  %v515_v27 = vsub.f32 %v499_v13, %v1143_v50  ;;  %v484_v28 = vmul.f32 0.5, %v805_v19  ;;  %v399_v8 = vadd.f32 %v1230_v33, %v1226_v25 }
 0x163   : > { %814 = vtanh.f32 %v447_v15  ;;  %v365_v29 = vadd.f32 %v364_v24, %v1220_v6  ;;  %v523_v30 = vmul.f32 %v507_v20, %v427_v47  ;;  %v492_v31 = vadd.f32 0.5, %v476_v22 }
 0x164   : > { %816 = vtanh.f32 %v455_v16  ;;  %v807_v35 = vpop.eup %806  ;;  %v531_v36 = vmul.f32 %v515_v27, %v435_v9  ;;  %v500_v37 = vadd.f32 0.5, %v484_v28  ;;  %v1263_v40 = vpop.f32.mrb[12].mxu0  ;;  %v413_v48 = vadd.f32 %v412_v26, %v1220_v6 }
 0x165   : > { %v448_v39 = vmul.f32 0.5, %v365_v29  ;;  %v1265_v41 = vpop.f32.mrb[12].mxu1  ;;  %v809_v42 = vpop.eup %808  ;;  %v539_v43 = vadd.f32 %v523_v30, %v1140_v49  ;;  %v508_v46 = vsub.f32 %v492_v31, %v1150_v51  ;;  %v477_v47 = vmul.f32 0.5, %v807_v35 }
 0x166   : > { %v370_v2 = vpop.f32.mrb[13].mxu0  ;;  %v418_v3 = vpop.f32.mrb[13].mxu1  ;;  %v547_v4 = vadd.f32 %v531_v36, %v1143_v50  ;;  %v516_v5 = vsub.f32 %v500_v37, %v1153_v52  ;;  %v485_v32 = vmul.f32 0.5, %v809_v42  ;;  %v456_v0 = vmul.f32 0.5, %v413_v48 }
 0x167   : > { %818 = vtanh.f32 %v448_v39  ;;  %555 = vst [vmem:[%s1274_s4] sm:$0xff] %v539_v43  ;;  %v524_v49 = vmul.f32 %v508_v46, %v428_v14  ;;  %v493_v7 = vadd.f32 0.5, %v477_v47  ;;  %v371_v12 = vadd.f32 %v370_v2, %v1220_v6 }
 0x168   : > { %v811_v9 = vpop.eup %810  ;;  %563 = vst [vmem:[%s1274_s4 + $0x40] sm:$0xff] %v547_v4  ;;  %v532_v10 = vmul.f32 %v516_v5, %v436_v21  ;;  %v501_v50 = vadd.f32 0.5, %v485_v32  ;;  %v1281_v13 = vpop.f32.mrb[14].mxu0  ;;  %820 = vtanh.f32 %v456_v0  ;;  %v357_v27 = vadd.f32 %v1239_v44, %v1226_v25 }
 0x169   : > { %v1283_v15 = vpop.f32.mrb[14].mxu1  ;;  %v813_v16 = vpop.eup %812  ;;  %v540_v14 = vadd.f32 %v524_v49, %v1150_v51  ;;  %v509_v19 = vsub.f32 %v493_v7, %v1160_v53  ;;  %v478_v33 = vmul.f32 0.5, %v811_v9  ;;  %v405_v51 = vadd.f32 %v1241_v45, %v1226_v25 }
 0x16a   : > { %v376_v20 = vpop.f32.mrb[15].mxu0  ;;  %v424_v22 = vpop.f32.mrb[15].mxu1  ;;  %v548_v21 = vadd.f32 %v532_v10, %v1153_v52  ;;  %v517_v24 = vsub.f32 %v501_v50, %v1163_v54  ;;  %v486_v26 = vmul.f32 0.5, %v813_v16  ;;  %v449_v30 = vmul.f32 0.5, %v371_v12 }
 0x16b   : > { %556 = vst [vmem:[%s1274_s4 + $0x8] sm:$0xff] %v540_v14  ;;  %v525_v28 = vmul.f32 %v509_v19, %v429_v23  ;;  %v494_v29 = vadd.f32 0.5, %v478_v33  ;;  %v438_v36 = vmax.f32 %v399_v8, 0.0  ;;  %v419_v52 = vadd.f32 %v418_v3, %v1220_v6 }
 0x16c   : > { %564 = vst [vmem:[%s1274_s4 + $0x48] sm:$0xff] %v548_v21  ;;  %v533_v35 = vmul.f32 %v517_v24, %v437_v34  ;;  %v502_v37 = vadd.f32 0.5, %v486_v26  ;;  %822 = vtanh.f32 %v449_v30  ;;  %v431_v47 = vmax.f32 %v357_v27, 0.0 }
 0x16d   : > { %v815_v31 = vpop.eup %814  ;;  %v541_v39 = vadd.f32 %v525_v28, %v1160_v53  ;;  %v510_v44 = vsub.f32 %v494_v29, %v1170_v55  ;;  %v457_v46 = vmul.f32 0.5, %v419_v52  ;;  %v439_v48 = vmax.f32 %v405_v51, 0.0 }
 0x16e   : > { %v817_v38 = vpop.eup %816  ;;  %v479_v23 = vmul.f32 0.5, %v815_v31  ;;  %v549_v42 = vadd.f32 %v533_v35, %v1163_v54  ;;  %v518_v45 = vsub.f32 %v502_v37, %v1173_v56  ;;  %v377_v5 = vadd.f32 %v376_v20, %v1220_v6 }
 0x16f   : > { %v487_v43 = vmul.f32 0.5, %v817_v38  ;;  %557 = vst [vmem:[%s1274_s4 + $0x10] sm:$0xff] %v541_v39  ;;  %v526_v34 = vmul.f32 %v510_v44, %v430_v11  ;;  %824 = vtanh.f32 %v457_v46  ;;  %v363_v49 = vadd.f32 %v1253_v17, %v1226_v25 }
 0x170   : > { %v495_v2 = vadd.f32 0.5, %v479_v23  ;;  %565 = vst [vmem:[%s1274_s4 + $0x50] sm:$0xff] %v549_v42  ;;  %v534_v4 = vmul.f32 %v518_v45, %v438_v36  ;;  %v450_v9 = vmul.f32 0.5, %v377_v5  ;;  %v425_v10 = vadd.f32 %v424_v22, %v1220_v6 }
 0x171   : > { %v819_v3 = vpop.eup %818  ;;  %v503_v53 = vadd.f32 0.5, %v487_v43  ;;  %v542_v54 = vadd.f32 %v526_v34, %v1170_v55  ;;  %v411_v55 = vadd.f32 %v1255_v18, %v1226_v25  ;;  %v432_v19 = vmax.f32 %v363_v49, 0.0 }
 0x172   : > { %v511_v32 = vsub.f32 %v495_v2, %v1180_v57  ;;  %v480_v7 = vmul.f32 0.5, %v819_v3  ;;  %v550_v8 = vadd.f32 %v534_v4, %v1173_v56  ;;  %v821_v50 = vpop.eup %820  ;;  %826 = vtanh.f32 %v450_v9 }
 0x173   : > { %v519_v0 = vsub.f32 %v503_v53, %v1183_v58  ;;  %558 = vst [vmem:[%s1274_s4 + $0x18] sm:$0xff] %v542_v54  ;;  %v488_v17 = vmul.f32 0.5, %v821_v50  ;;  %v458_v14 = vmul.f32 0.5, %v425_v10  ;;  %v440_v21 = vmax.f32 %v411_v55, 0.0 }
 0x174   : > { %v527_v11 = vmul.f32 %v511_v32, %v431_v47  ;;  %v496_v12 = vadd.f32 0.5, %v480_v7  ;;  %566 = vst [vmem:[%s1274_s4 + $0x58] sm:$0xff] %v550_v8  ;;  %v369_v26 = vadd.f32 %v1263_v40, %v1226_v25  ;;  %v375_v39 = vadd.f32 %v1281_v13, %v1226_v25 }
 0x175   : > { %v535_v16 = vmul.f32 %v519_v0, %v439_v48  ;;  %v504_v20 = vadd.f32 0.5, %v488_v17  ;;  %828 = vtanh.f32 %v458_v14  ;;  %v423_v42 = vadd.f32 %v1283_v15, %v1226_v25 }
 0x176   : > { %v543_v56 = vadd.f32 %v527_v11, %v1180_v57  ;;  %v512_v33 = vsub.f32 %v496_v12, %v1190_v59  ;;  %v823_v22 = vpop.eup %822  ;;  %v433_v35 = vmax.f32 %v369_v26, 0.0  ;;  %v434_v34 = vmax.f32 %v375_v39, 0.0 }
 0x177   : > { %v551_v6 = vadd.f32 %v535_v16, %v1183_v58  ;;  %v520_v24 = vsub.f32 %v504_v20, %v1193_v60  ;;  %v481_v57 = vmul.f32 0.5, %v823_v22  ;;  %v417_v58 = vadd.f32 %v1265_v41, %v1226_v25 }
 0x178   : > { %559 = vst [vmem:[%s1274_s4 + $0x20] sm:$0xff] %v543_v56  ;;  %v528_v18 = vmul.f32 %v512_v33, %v432_v19  ;;  %v442_v48 = vmax.f32 %v423_v42, 0.0 }
 0x179   : > { %567 = vst [vmem:[%s1274_s4 + $0x60] sm:$0xff] %v551_v6  ;;  %v825_v28 = vpop.eup %824  ;;  %v536_v29 = vmul.f32 %v520_v24, %v440_v21  ;;  %v497_v51 = vadd.f32 0.5, %v481_v57 }
 0x17a   : > { %v544_v27 = vadd.f32 %v528_v18, %v1190_v59  ;;  %v489_v30 = vmul.f32 0.5, %v825_v28  ;;  %v441_v59 = vmax.f32 %v417_v58, 0.0 }
 0x17b   : > { %v552_v31 = vadd.f32 %v536_v29, %v1193_v60  ;;  %v513_v36 = vsub.f32 %v497_v51, %v1200_v61 }
 0x17c   : > { %560 = vst [vmem:[%s1274_s4 + $0x28] sm:$0xff] %v544_v27  ;;  %v505_v37 = vadd.f32 0.5, %v489_v30  ;;  %v827_v52 = vpop.eup %826 }
 0x17d   : > { %568 = vst [vmem:[%s1274_s4 + $0x68] sm:$0xff] %v552_v31  ;;  %v529_v40 = vmul.f32 %v513_v36, %v433_v35  ;;  %v482_v44 = vmul.f32 0.5, %v827_v52 }
 0x17e   : > { %v521_v38 = vsub.f32 %v505_v37, %v1203_v62 }
 0x17f   : > { %v829_v41 = vpop.eup %828  ;;  %v545_v60 = vadd.f32 %v529_v40, %v1200_v61  ;;  %v498_v45 = vadd.f32 0.5, %v482_v44 }
 0x180   : > { %v537_v23 = vmul.f32 %v521_v38, %v441_v59  ;;  %v490_v43 = vmul.f32 0.5, %v829_v41 }
 0x181   : > { %561 = vst [vmem:[%s1274_s4 + $0x30] sm:$0xff] %v545_v60  ;;  %v514_v13 = vsub.f32 %v498_v45, %v1210_v63 }
 0x182   : > { %v553_v46 = vadd.f32 %v537_v23, %v1203_v62  ;;  %v506_v47 = vadd.f32 0.5, %v490_v43 }
 0x183   : > { %v530_v61 = vmul.f32 %v514_v13, %v434_v34 }
 0x184   : > { %569 = vst [vmem:[%s1274_s4 + $0x70] sm:$0xff] %v553_v46  ;;  %v522_v2 = vsub.f32 %v506_v47, %v1213_v1 }
 0x185   : > { %v546_v25 = vadd.f32 %v530_v61, %v1210_v63 }
 0x186   : > { %v538_v15 = vmul.f32 %v522_v2, %v442_v48 }
 0x187   : > { %562 = vst [vmem:[%s1274_s4 + $0x38] sm:$0xff] %v546_v25 }
 0x188   : > { %v554_v62 = vadd.f32 %v538_v15, %v1213_v1 }
 0x18a   : > { %570 = vst [vmem:[%s1274_s4 + $0x78] sm:$0xff] %v554_v62 }
 0x18b   : > { %901 = shalt.err (!%p898_p7)
}
 0x18c   : > { %s902_s30 = scalar_lea.hbm %s1346_s11, 2048  ;;  %s906_s8 = scalar_lea.hbm %s1397_s3, 8192 }
 0x18d   : > { %p903_p9 = scmp.ne.s32.totalorder %s1346_s11, %s902_s30  ;;  %p907_p5 = scmp.lt.u32.totalorder %s1346_s11, %s1397_s3 }
 0x18e   : > { %p908_p10 = scmp.lt.u32.totalorder %s906_s8, %s902_s30  ;;  %p910_p1 = scmp.lt.u32.totalorder %s902_s30, %s1346_s11 }
 0x18f   : > { %p904_p11 = pnand %p903_p9, %p1073_p12 }
 0x190   : > { %p909_p2 = por %p908_p10, %p907_p5 }
 0x191   : > { %p905_p0 = pneg %p904_p11 }
 0x192   : > { %p911_p4 = por %p910_p1, %p909_p2 }
 0x194   : > { %p912_p6 = pnand %p911_p4, %p905_p0 }
 0x196   : > { %915 = shalt.err (!%p912_p6)
}
 0x197   : > { %s968_s20 = smov 128   ;;  %s969_s4 = smov 8  }
 0x198   : > { %740 = dma.vmem_to_hbm [thread:$0]  (%p1073_p12), %s1348_s26, 2048, %s1346_s11, %s572_s27, %s968_s20, %s968_s20, %s969_s4  }
 0x199 PF: > { %p757_p8 = scmp.ge.s32.totalorder %s958_s15, 2  ;;  %s600_s25 = sand.u32 1, %s946_s12  }
 0x19a   : > { %p1412_p13 = scmp.ne.s32.totalorder %s1402_s19, 0  ;;  %s601_s5 = scalar_lea.sflag [#allocation4], %s600_s25 }
 0x19c   : > { %p751_p3 = pnand %p757_p8, %p1412_p13 }
 0x19e   : > { %941 = dma.done.wait (!%p751_p3), %s601_s5, 2048  }
 0x19f   : > { %943 = vsyncadd (!%p751_p3), %s601_s5, 4294965248  ;;  %p17_p7 = scmp.ge.s32.totalorder %s1043_s24, 6   ;;  %s1413_s12 = smov %s950_s13 }
 0x1a0   : > { %s1414_s13 = smov %s954_s14  ;;  %s1415_s14 = smov %s1069_s17 }
 0x1a1   : > { %s1416_s15 = smov %s1043_s24  ;;  %19 = sbr.rel (!%p17_p7) target bundleno = 6 (0x6), region = 81 }
 0x1a8   :  { %606 = vsyncpa [#allocation3], 1 }
 0x1a9   :  { %608 = vsyncpa [#allocation3 + $0x1], 1 }
 0x1aa   :  { %609 = vsyncpa [#allocation6], 1 }
 0x1ab   :  { %610 = vsyncpa [#allocation4], 1 }
 0x1ac   :  { %612 = vsyncpa [#allocation4 + $0x1], 1 }

</bundles_post_ra>
